<compile_context>
chip_gen: v6e
topology: v6e:2x2x1
jax: 0.10.0
libtpu: 0.0.40
codegen_flags: <defaults>
</compile_context>

<pallas_src>
import math

import jax
import jax.numpy as jnp
from jax import lax
from jax.experimental import pallas as pl
from jax.experimental.pallas import tpu as pltpu


def _disp_head_tile_kernel(w_ref, b_ref, x_ref, o_ref):
    """One (batch, row-tile) grid step.

    w_ref: (Cin*9,)          f32  SMEM   conv1 weights flattened as (c, dy, dx)
    b_ref: (8,)              f32  SMEM   [w2_t]*4 ++ [b1*w2_t + b2]*4  (t = 2a+b)
    x_ref: (Cin, TH+2, W+2)  bf16 VMEM   padded, halo'd input row tile (W on lanes)
    o_ref: (4, TH, W)        f32  VMEM   sigmoid(deconv taps), lane dim = W
    """
    cin = x_ref.shape[0]
    _, TH, W = o_ref.shape

    def add_channel(c, acc):
        xc = x_ref[c].astype(jnp.float32)           # one load + one up-cast per channel
        for dy in range(3):
            for dx in range(3):
                wv = w_ref[c * 9 + dy * 3 + dx]     # scalar from SMEM
                acc = acc + wv * lax.slice(xc, (dy, dx), (dy + TH, dx + W))
        return acc

    acc0 = jnp.zeros((TH, W), jnp.float32)
    if cin <= 32:
        # fully unrolled VPU path (the review's small-Cin recommendation)
        acc = acc0
        for c in range(cin):
            acc = add_channel(c, acc)
    else:
        # rolled fallback for large Cin (dynamic SMEM weight reads)
        acc = lax.fori_loop(0, cin, add_channel, acc0, unroll=4)

    # ConvTranspose2d(1,1,k=2,s=2) folded into 4 per-tap affines, then sigmoid.
    for t in range(4):
        o_ref[t] = jax.nn.sigmoid(acc * b_ref[t] + b_ref[4 + t])


def _pick_tile_h(h, max_th=32):
    """Largest divisor of h that is <= max_th, preferring >= 2 row tiles."""
    divs = [d for d in range(1, h + 1) if h % d == 0 and d <= max_th]
    multi = [d for d in divs if d < h]
    pool = multi if multi else divs
    return max(pool)


def newcrfs_deconv_disp_head(x, conv1_w, conv1_b, up_w, up_b,
                             *, compute_dtype=jnp.bfloat16, max_tile_h=32):
    """Forward pass of NeWCRFsDeconvDispHead.

    x:       (N, Cin, H, W) float32 (NCHW, PyTorch convention)
    conv1_w: (1, Cin, 3, 3)   conv1_b: (1,)
    up_w:    (1, 1, 2, 2)     up_b:    (1,)
    returns  (N, 1, 2H, 2W) float32
    """
    N, Cin, H, W = x.shape
    assert conv1_w.shape == (1, Cin, 3, 3)
    assert conv1_b.shape == (1,)
    assert up_w.shape == (1, 1, 2, 2)
    assert up_b.shape == (1,)

    TH = _pick_tile_h(H, max_tile_h)
    nt = H // TH

    # Channel-major padded input, bf16 for the HBM stream; W stays on lanes.
    x_pad = jnp.pad(x, ((0, 0), (0, 0), (1, 1), (1, 1))).astype(compute_dtype)
    # Row tiles with a 2-row halo: (N, nt, Cin, TH+2, W+2).
    x_tiles = jnp.stack(
        [x_pad[:, :, i * TH: i * TH + TH + 2, :] for i in range(nt)], axis=1)

    # conv1 weights flattened (c, dy, dx) for SMEM scalar reads.
    w_flat = conv1_w[0].reshape(-1).astype(jnp.float32)               # (Cin*9,)
    # deconv folded into a per-tap affine of the conv output:
    #   tap_t = conv_out * w2[t] + (b1 * w2[t] + b2),   t = 2*a + b
    w2 = up_w.reshape(4).astype(jnp.float32)
    b1 = conv1_b.astype(jnp.float32)[0]
    b2 = up_b.astype(jnp.float32)[0]
    affine = jnp.concatenate([w2, b1 * w2 + b2])                      # (8,)

    # VMEM budget: double-buffered input tile (bf16 -> 16-sublane rounding) +
    # double-buffered output tile, capped at 32 MiB (v7x headroom).
    def _rup(a, b):
        return -(-a // b) * b

    in_blk = Cin * _rup(TH + 2, 16) * _rup(W + 2, 128) * 2
    out_blk = 4 * _rup(TH, 8) * _rup(W, 128) * 4
    vmem_bytes = int(min(max(2 * (in_blk + out_blk) + (2 << 20), 8 << 20), 32 << 20))

    cost = pl.CostEstimate(
        flops=int(2 * N * H * W * (9 * Cin + 4)),
        transcendentals=int(N * H * W * 4),
        bytes_accessed=int(x_tiles.size) * 2 + int(N * H * W * 4) * 4
        + int(w_flat.size + affine.size) * 4,
    )

    out4 = pl.pallas_call(
        _disp_head_tile_kernel,
        out_shape=jax.ShapeDtypeStruct((N, nt, 4, TH, W), jnp.float32),
        grid_spec=pltpu.PrefetchScalarGridSpec(
            num_scalar_prefetch=0,
            grid=(N, nt),
            in_specs=[
                pl.BlockSpec(memory_space=pltpu.MemorySpace.SMEM),   # conv1 weights
                pl.BlockSpec(memory_space=pltpu.MemorySpace.SMEM),   # fused affine
                pl.BlockSpec((None, None, Cin, TH + 2, W + 2),
                             lambda n, i: (n, i, 0, 0, 0)),
            ],
            out_specs=pl.BlockSpec((None, None, 4, TH, W),
                                   lambda n, i: (n, i, 0, 0, 0)),
        ),
        compiler_params=pltpu.CompilerParams(
            dimension_semantics=("parallel", "parallel"),
            vmem_limit_bytes=vmem_bytes,
        ),
        cost_estimate=cost,
    )(w_flat, affine, x_tiles)

    # Pixel-shuffle the 4 deconv taps (t = 2a + b) back to (N, 1, 2H, 2W).
    out = (out4.reshape(N, nt, 2, 2, TH, W)
               .transpose(0, 1, 4, 2, 5, 3)          # (N, nt, TH, a, W, b)
               .reshape(N, 2 * H, 2 * W))
    return out[:, None, :, :]


if __name__ == "__main__":
    key = jax.random.PRNGKey(0)
    k1, k2, k3, k4, k5 = jax.random.split(key, 5)

    # NeWCRFsDeconvDispHead(input_dim=8) at a small test shape
    N, Cin, H, W = 2, 8, 16, 16

    x = jax.random.normal(k1, (N, Cin, H, W), jnp.float32)
    bound1 = 1.0 / math.sqrt(Cin * 3 * 3)
    conv1_w = jax.random.uniform(k2, (1, Cin, 3, 3), jnp.float32, -bound1, bound1)
    conv1_b = jax.random.uniform(k3, (1,), jnp.float32, -bound1, bound1)
    bound2 = 1.0 / math.sqrt(1 * 2 * 2)
    up_w = jax.random.uniform(k4, (1, 1, 2, 2), jnp.float32, -bound2, bound2)
    up_b = jax.random.uniform(k5, (1,), jnp.float32, -bound2, bound2)

    head = jax.jit(newcrfs_deconv_disp_head)
    y = jax.block_until_ready(head(x, conv1_w, conv1_b, up_w, up_b))
    assert y.shape == (N, 1, 2 * H, 2 * W)

    # plain-JAX f32 reference of the PyTorch forward
    conv = lax.conv_general_dilated(
        x, conv1_w, (1, 1), ((1, 1), (1, 1)),
        dimension_numbers=("NCHW", "OIHW", "NCHW")) + conv1_b.reshape(1, 1, 1, 1)
    # ConvTranspose2d(1, 1, k=2, s=2) == lhs-dilated conv with spatially flipped kernel
    up = lax.conv_general_dilated(
        conv, up_w[:, :, ::-1, ::-1], (1, 1), ((1, 1), (1, 1)),
        lhs_dilation=(2, 2),
        dimension_numbers=("NCHW", "OIHW", "NCHW")) + up_b.reshape(1, 1, 1, 1)
    ref = jax.nn.sigmoid(up)

    err = float(jnp.max(jnp.abs(y - ref)))
    assert err < 5e-3, f"mismatch vs reference: max abs err {err}"
    print("KERNEL_OK")
</pallas_src>

<mosaic_0001>
module attributes {stable_mosaic.version = 11 : i64} {
  func.func @_disp_head_tile_kernel(%arg0: i32, %arg1: i32, %arg2: memref<72xf32, #tpu.memory_space<smem>>, %arg3: memref<8xf32, #tpu.memory_space<smem>>, %arg4: memref<1x1x8x10x18xbf16, #tpu.memory_space<vmem>>, %arg5: memref<1x1x4x8x16xf32, #tpu.memory_space<vmem>>) attributes {dimension_semantics = [#tpu.dimension_semantics<parallel>, #tpu.dimension_semantics<parallel>], iteration_bounds = array<i64: 2, 2>, scalar_prefetch = 0 : i64, scratch_operands = 0 : i64, tpu.core_type = #tpu.core_type<tc>, window_params = [{transform_indices = @transform_0, window_bounds = array<i64: 72>}, {transform_indices = @transform_1, window_bounds = array<i64: 8>}, {transform_indices = @transform_2, window_bounds = array<i64: 1, 1, 8, 10, 18>}, {transform_indices = @transform_3, window_bounds = array<i64: 1, 1, 4, 8, 16>}]} {
    %cst = arith.constant 0.000000e+00 : f32
    %0 = vector.broadcast %cst : f32 to vector<8x16xf32>
    %c0 = arith.constant 0 : index
    %c0_0 = arith.constant 0 : index
    %c0_1 = arith.constant 0 : index
    %c0_2 = arith.constant 0 : index
    %c0_3 = arith.constant 0 : index
    %1 = vector.load %arg4[%c0, %c0_0, %c0_1, %c0_2, %c0_3] : memref<1x1x8x10x18xbf16, #tpu.memory_space<vmem>>, vector<1x1x1x10x18xbf16>
    %2 = vector.shape_cast %1 : vector<1x1x1x10x18xbf16> to vector<10x18xbf16>
    %3 = arith.extf %2 : vector<10x18xbf16> to vector<10x18xf32>
    %c0_4 = arith.constant 0 : index
    %4 = memref.load %arg2[%c0_4] : memref<72xf32, #tpu.memory_space<smem>>
    %5 = vector.extract_strided_slice %3 {offsets = [0, 0], sizes = [8, 16], strides = [1, 1]} : vector<10x18xf32> to vector<8x16xf32>
    %6 = vector.broadcast %4 : f32 to vector<8x16xf32>
    %7 = arith.mulf %6, %5 : vector<8x16xf32>
    %8 = arith.addf %0, %7 : vector<8x16xf32>
    %c1 = arith.constant 1 : index
    %9 = memref.load %arg2[%c1] : memref<72xf32, #tpu.memory_space<smem>>
    %10 = vector.extract_strided_slice %3 {offsets = [0, 1], sizes = [8, 16], strides = [1, 1]} : vector<10x18xf32> to vector<8x16xf32>
    %11 = vector.broadcast %9 : f32 to vector<8x16xf32>
    %12 = arith.mulf %11, %10 : vector<8x16xf32>
    %13 = arith.addf %8, %12 : vector<8x16xf32>
    %c2 = arith.constant 2 : index
    %14 = memref.load %arg2[%c2] : memref<72xf32, #tpu.memory_space<smem>>
    %15 = vector.extract_strided_slice %3 {offsets = [0, 2], sizes = [8, 16], strides = [1, 1]} : vector<10x18xf32> to vector<8x16xf32>
    %16 = vector.broadcast %14 : f32 to vector<8x16xf32>
    %17 = arith.mulf %16, %15 : vector<8x16xf32>
    %18 = arith.addf %13, %17 : vector<8x16xf32>
    %c3 = arith.constant 3 : index
    %19 = memref.load %arg2[%c3] : memref<72xf32, #tpu.memory_space<smem>>
    %20 = vector.extract_strided_slice %3 {offsets = [1, 0], sizes = [8, 16], strides = [1, 1]} : vector<10x18xf32> to vector<8x16xf32>
    %21 = vector.broadcast %19 : f32 to vector<8x16xf32>
    %22 = arith.mulf %21, %20 : vector<8x16xf32>
    %23 = arith.addf %18, %22 : vector<8x16xf32>
    %c4 = arith.constant 4 : index
    %24 = memref.load %arg2[%c4] : memref<72xf32, #tpu.memory_space<smem>>
    %25 = vector.extract_strided_slice %3 {offsets = [1, 1], sizes = [8, 16], strides = [1, 1]} : vector<10x18xf32> to vector<8x16xf32>
    %26 = vector.broadcast %24 : f32 to vector<8x16xf32>
    %27 = arith.mulf %26, %25 : vector<8x16xf32>
    %28 = arith.addf %23, %27 : vector<8x16xf32>
    %c5 = arith.constant 5 : index
    %29 = memref.load %arg2[%c5] : memref<72xf32, #tpu.memory_space<smem>>
    %30 = vector.extract_strided_slice %3 {offsets = [1, 2], sizes = [8, 16], strides = [1, 1]} : vector<10x18xf32> to vector<8x16xf32>
    %31 = vector.broadcast %29 : f32 to vector<8x16xf32>
    %32 = arith.mulf %31, %30 : vector<8x16xf32>
    %33 = arith.addf %28, %32 : vector<8x16xf32>
    %c6 = arith.constant 6 : index
    %34 = memref.load %arg2[%c6] : memref<72xf32, #tpu.memory_space<smem>>
    %35 = vector.extract_strided_slice %3 {offsets = [2, 0], sizes = [8, 16], strides = [1, 1]} : vector<10x18xf32> to vector<8x16xf32>
    %36 = vector.broadcast %34 : f32 to vector<8x16xf32>
    %37 = arith.mulf %36, %35 : vector<8x16xf32>
    %38 = arith.addf %33, %37 : vector<8x16xf32>
    %c7 = arith.constant 7 : index
    %39 = memref.load %arg2[%c7] : memref<72xf32, #tpu.memory_space<smem>>
    %40 = vector.extract_strided_slice %3 {offsets = [2, 1], sizes = [8, 16], strides = [1, 1]} : vector<10x18xf32> to vector<8x16xf32>
    %41 = vector.broadcast %39 : f32 to vector<8x16xf32>
    %42 = arith.mulf %41, %40 : vector<8x16xf32>
    %43 = arith.addf %38, %42 : vector<8x16xf32>
    %c8 = arith.constant 8 : index
    %44 = memref.load %arg2[%c8] : memref<72xf32, #tpu.memory_space<smem>>
    %45 = vector.extract_strided_slice %3 {offsets = [2, 2], sizes = [8, 16], strides = [1, 1]} : vector<10x18xf32> to vector<8x16xf32>
    %46 = vector.broadcast %44 : f32 to vector<8x16xf32>
    %47 = arith.mulf %46, %45 : vector<8x16xf32>
    %48 = arith.addf %43, %47 : vector<8x16xf32>
    %c0_5 = arith.constant 0 : index
    %c0_6 = arith.constant 0 : index
    %c1_7 = arith.constant 1 : index
    %c0_8 = arith.constant 0 : index
    %c0_9 = arith.constant 0 : index
    %49 = vector.load %arg4[%c0_5, %c0_6, %c1_7, %c0_8, %c0_9] : memref<1x1x8x10x18xbf16, #tpu.memory_space<vmem>>, vector<1x1x1x10x18xbf16>
    %50 = vector.shape_cast %49 : vector<1x1x1x10x18xbf16> to vector<10x18xbf16>
    %51 = arith.extf %50 : vector<10x18xbf16> to vector<10x18xf32>
    %c9 = arith.constant 9 : index
    %52 = memref.load %arg2[%c9] : memref<72xf32, #tpu.memory_space<smem>>
    %53 = vector.extract_strided_slice %51 {offsets = [0, 0], sizes = [8, 16], strides = [1, 1]} : vector<10x18xf32> to vector<8x16xf32>
    %54 = vector.broadcast %52 : f32 to vector<8x16xf32>
    %55 = arith.mulf %54, %53 : vector<8x16xf32>
    %56 = arith.addf %48, %55 : vector<8x16xf32>
    %c10 = arith.constant 10 : index
    %57 = memref.load %arg2[%c10] : memref<72xf32, #tpu.memory_space<smem>>
    %58 = vector.extract_strided_slice %51 {offsets = [0, 1], sizes = [8, 16], strides = [1, 1]} : vector<10x18xf32> to vector<8x16xf32>
    %59 = vector.broadcast %57 : f32 to vector<8x16xf32>
    %60 = arith.mulf %59, %58 : vector<8x16xf32>
    %61 = arith.addf %56, %60 : vector<8x16xf32>
    %c11 = arith.constant 11 : index
    %62 = memref.load %arg2[%c11] : memref<72xf32, #tpu.memory_space<smem>>
    %63 = vector.extract_strided_slice %51 {offsets = [0, 2], sizes = [8, 16], strides = [1, 1]} : vector<10x18xf32> to vector<8x16xf32>
    %64 = vector.broadcast %62 : f32 to vector<8x16xf32>
    %65 = arith.mulf %64, %63 : vector<8x16xf32>
    %66 = arith.addf %61, %65 : vector<8x16xf32>
    %c12 = arith.constant 12 : index
    %67 = memref.load %arg2[%c12] : memref<72xf32, #tpu.memory_space<smem>>
    %68 = vector.extract_strided_slice %51 {offsets = [1, 0], sizes = [8, 16], strides = [1, 1]} : vector<10x18xf32> to vector<8x16xf32>
    %69 = vector.broadcast %67 : f32 to vector<8x16xf32>
    %70 = arith.mulf %69, %68 : vector<8x16xf32>
    %71 = arith.addf %66, %70 : vector<8x16xf32>
    %c13 = arith.constant 13 : index
    %72 = memref.load %arg2[%c13] : memref<72xf32, #tpu.memory_space<smem>>
    %73 = vector.extract_strided_slice %51 {offsets = [1, 1], sizes = [8, 16], strides = [1, 1]} : vector<10x18xf32> to vector<8x16xf32>
    %74 = vector.broadcast %72 : f32 to vector<8x16xf32>
    %75 = arith.mulf %74, %73 : vector<8x16xf32>
    %76 = arith.addf %71, %75 : vector<8x16xf32>
    %c14 = arith.constant 14 : index
    %77 = memref.load %arg2[%c14] : memref<72xf32, #tpu.memory_space<smem>>
    %78 = vector.extract_strided_slice %51 {offsets = [1, 2], sizes = [8, 16], strides = [1, 1]} : vector<10x18xf32> to vector<8x16xf32>
    %79 = vector.broadcast %77 : f32 to vector<8x16xf32>
    %80 = arith.mulf %79, %78 : vector<8x16xf32>
    %81 = arith.addf %76, %80 : vector<8x16xf32>
    %c15 = arith.constant 15 : index
    %82 = memref.load %arg2[%c15] : memref<72xf32, #tpu.memory_space<smem>>
    %83 = vector.extract_strided_slice %51 {offsets = [2, 0], sizes = [8, 16], strides = [1, 1]} : vector<10x18xf32> to vector<8x16xf32>
    %84 = vector.broadcast %82 : f32 to vector<8x16xf32>
    %85 = arith.mulf %84, %83 : vector<8x16xf32>
    %86 = arith.addf %81, %85 : vector<8x16xf32>
    %c16 = arith.constant 16 : index
    %87 = memref.load %arg2[%c16] : memref<72xf32, #tpu.memory_space<smem>>
    %88 = vector.extract_strided_slice %51 {offsets = [2, 1], sizes = [8, 16], strides = [1, 1]} : vector<10x18xf32> to vector<8x16xf32>
    %89 = vector.broadcast %87 : f32 to vector<8x16xf32>
    %90 = arith.mulf %89, %88 : vector<8x16xf32>
    %91 = arith.addf %86, %90 : vector<8x16xf32>
    %c17 = arith.constant 17 : index
    %92 = memref.load %arg2[%c17] : memref<72xf32, #tpu.memory_space<smem>>
    %93 = vector.extract_strided_slice %51 {offsets = [2, 2], sizes = [8, 16], strides = [1, 1]} : vector<10x18xf32> to vector<8x16xf32>
    %94 = vector.broadcast %92 : f32 to vector<8x16xf32>
    %95 = arith.mulf %94, %93 : vector<8x16xf32>
    %96 = arith.addf %91, %95 : vector<8x16xf32>
    %c0_10 = arith.constant 0 : index
    %c0_11 = arith.constant 0 : index
    %c2_12 = arith.constant 2 : index
    %c0_13 = arith.constant 0 : index
    %c0_14 = arith.constant 0 : index
    %97 = vector.load %arg4[%c0_10, %c0_11, %c2_12, %c0_13, %c0_14] : memref<1x1x8x10x18xbf16, #tpu.memory_space<vmem>>, vector<1x1x1x10x18xbf16>
    %98 = vector.shape_cast %97 : vector<1x1x1x10x18xbf16> to vector<10x18xbf16>
    %99 = arith.extf %98 : vector<10x18xbf16> to vector<10x18xf32>
    %c18 = arith.constant 18 : index
    %100 = memref.load %arg2[%c18] : memref<72xf32, #tpu.memory_space<smem>>
    %101 = vector.extract_strided_slice %99 {offsets = [0, 0], sizes = [8, 16], strides = [1, 1]} : vector<10x18xf32> to vector<8x16xf32>
    %102 = vector.broadcast %100 : f32 to vector<8x16xf32>
    %103 = arith.mulf %102, %101 : vector<8x16xf32>
    %104 = arith.addf %96, %103 : vector<8x16xf32>
    %c19 = arith.constant 19 : index
    %105 = memref.load %arg2[%c19] : memref<72xf32, #tpu.memory_space<smem>>
    %106 = vector.extract_strided_slice %99 {offsets = [0, 1], sizes = [8, 16], strides = [1, 1]} : vector<10x18xf32> to vector<8x16xf32>
    %107 = vector.broadcast %105 : f32 to vector<8x16xf32>
    %108 = arith.mulf %107, %106 : vector<8x16xf32>
    %109 = arith.addf %104, %108 : vector<8x16xf32>
    %c20 = arith.constant 20 : index
    %110 = memref.load %arg2[%c20] : memref<72xf32, #tpu.memory_space<smem>>
    %111 = vector.extract_strided_slice %99 {offsets = [0, 2], sizes = [8, 16], strides = [1, 1]} : vector<10x18xf32> to vector<8x16xf32>
    %112 = vector.broadcast %110 : f32 to vector<8x16xf32>
    %113 = arith.mulf %112, %111 : vector<8x16xf32>
    %114 = arith.addf %109, %113 : vector<8x16xf32>
    %c21 = arith.constant 21 : index
    %115 = memref.load %arg2[%c21] : memref<72xf32, #tpu.memory_space<smem>>
    %116 = vector.extract_strided_slice %99 {offsets = [1, 0], sizes = [8, 16], strides = [1, 1]} : vector<10x18xf32> to vector<8x16xf32>
    %117 = vector.broadcast %115 : f32 to vector<8x16xf32>
    %118 = arith.mulf %117, %116 : vector<8x16xf32>
    %119 = arith.addf %114, %118 : vector<8x16xf32>
    %c22 = arith.constant 22 : index
    %120 = memref.load %arg2[%c22] : memref<72xf32, #tpu.memory_space<smem>>
    %121 = vector.extract_strided_slice %99 {offsets = [1, 1], sizes = [8, 16], strides = [1, 1]} : vector<10x18xf32> to vector<8x16xf32>
    %122 = vector.broadcast %120 : f32 to vector<8x16xf32>
    %123 = arith.mulf %122, %121 : vector<8x16xf32>
    %124 = arith.addf %119, %123 : vector<8x16xf32>
    %c23 = arith.constant 23 : index
    %125 = memref.load %arg2[%c23] : memref<72xf32, #tpu.memory_space<smem>>
    %126 = vector.extract_strided_slice %99 {offsets = [1, 2], sizes = [8, 16], strides = [1, 1]} : vector<10x18xf32> to vector<8x16xf32>
    %127 = vector.broadcast %125 : f32 to vector<8x16xf32>
    %128 = arith.mulf %127, %126 : vector<8x16xf32>
    %129 = arith.addf %124, %128 : vector<8x16xf32>
    %c24 = arith.constant 24 : index
    %130 = memref.load %arg2[%c24] : memref<72xf32, #tpu.memory_space<smem>>
    %131 = vector.extract_strided_slice %99 {offsets = [2, 0], sizes = [8, 16], strides = [1, 1]} : vector<10x18xf32> to vector<8x16xf32>
    %132 = vector.broadcast %130 : f32 to vector<8x16xf32>
    %133 = arith.mulf %132, %131 : vector<8x16xf32>
    %134 = arith.addf %129, %133 : vector<8x16xf32>
    %c25 = arith.constant 25 : index
    %135 = memref.load %arg2[%c25] : memref<72xf32, #tpu.memory_space<smem>>
    %136 = vector.extract_strided_slice %99 {offsets = [2, 1], sizes = [8, 16], strides = [1, 1]} : vector<10x18xf32> to vector<8x16xf32>
    %137 = vector.broadcast %135 : f32 to vector<8x16xf32>
    %138 = arith.mulf %137, %136 : vector<8x16xf32>
    %139 = arith.addf %134, %138 : vector<8x16xf32>
    %c26 = arith.constant 26 : index
    %140 = memref.load %arg2[%c26] : memref<72xf32, #tpu.memory_space<smem>>
    %141 = vector.extract_strided_slice %99 {offsets = [2, 2], sizes = [8, 16], strides = [1, 1]} : vector<10x18xf32> to vector<8x16xf32>
    %142 = vector.broadcast %140 : f32 to vector<8x16xf32>
    %143 = arith.mulf %142, %141 : vector<8x16xf32>
    %144 = arith.addf %139, %143 : vector<8x16xf32>
    %c0_15 = arith.constant 0 : index
    %c0_16 = arith.constant 0 : index
    %c3_17 = arith.constant 3 : index
    %c0_18 = arith.constant 0 : index
    %c0_19 = arith.constant 0 : index
    %145 = vector.load %arg4[%c0_15, %c0_16, %c3_17, %c0_18, %c0_19] : memref<1x1x8x10x18xbf16, #tpu.memory_space<vmem>>, vector<1x1x1x10x18xbf16>
    %146 = vector.shape_cast %145 : vector<1x1x1x10x18xbf16> to vector<10x18xbf16>
    %147 = arith.extf %146 : vector<10x18xbf16> to vector<10x18xf32>
    %c27 = arith.constant 27 : index
    %148 = memref.load %arg2[%c27] : memref<72xf32, #tpu.memory_space<smem>>
    %149 = vector.extract_strided_slice %147 {offsets = [0, 0], sizes = [8, 16], strides = [1, 1]} : vector<10x18xf32> to vector<8x16xf32>
    %150 = vector.broadcast %148 : f32 to vector<8x16xf32>
    %151 = arith.mulf %150, %149 : vector<8x16xf32>
    %152 = arith.addf %144, %151 : vector<8x16xf32>
    %c28 = arith.constant 28 : index
    %153 = memref.load %arg2[%c28] : memref<72xf32, #tpu.memory_space<smem>>
    %154 = vector.extract_strided_slice %147 {offsets = [0, 1], sizes = [8, 16], strides = [1, 1]} : vector<10x18xf32> to vector<8x16xf32>
    %155 = vector.broadcast %153 : f32 to vector<8x16xf32>
    %156 = arith.mulf %155, %154 : vector<8x16xf32>
    %157 = arith.addf %152, %156 : vector<8x16xf32>
    %c29 = arith.constant 29 : index
    %158 = memref.load %arg2[%c29] : memref<72xf32, #tpu.memory_space<smem>>
    %159 = vector.extract_strided_slice %147 {offsets = [0, 2], sizes = [8, 16], strides = [1, 1]} : vector<10x18xf32> to vector<8x16xf32>
    %160 = vector.broadcast %158 : f32 to vector<8x16xf32>
    %161 = arith.mulf %160, %159 : vector<8x16xf32>
    %162 = arith.addf %157, %161 : vector<8x16xf32>
    %c30 = arith.constant 30 : index
    %163 = memref.load %arg2[%c30] : memref<72xf32, #tpu.memory_space<smem>>
    %164 = vector.extract_strided_slice %147 {offsets = [1, 0], sizes = [8, 16], strides = [1, 1]} : vector<10x18xf32> to vector<8x16xf32>
    %165 = vector.broadcast %163 : f32 to vector<8x16xf32>
    %166 = arith.mulf %165, %164 : vector<8x16xf32>
    %167 = arith.addf %162, %166 : vector<8x16xf32>
    %c31 = arith.constant 31 : index
    %168 = memref.load %arg2[%c31] : memref<72xf32, #tpu.memory_space<smem>>
    %169 = vector.extract_strided_slice %147 {offsets = [1, 1], sizes = [8, 16], strides = [1, 1]} : vector<10x18xf32> to vector<8x16xf32>
    %170 = vector.broadcast %168 : f32 to vector<8x16xf32>
    %171 = arith.mulf %170, %169 : vector<8x16xf32>
    %172 = arith.addf %167, %171 : vector<8x16xf32>
    %c32 = arith.constant 32 : index
    %173 = memref.load %arg2[%c32] : memref<72xf32, #tpu.memory_space<smem>>
    %174 = vector.extract_strided_slice %147 {offsets = [1, 2], sizes = [8, 16], strides = [1, 1]} : vector<10x18xf32> to vector<8x16xf32>
    %175 = vector.broadcast %173 : f32 to vector<8x16xf32>
    %176 = arith.mulf %175, %174 : vector<8x16xf32>
    %177 = arith.addf %172, %176 : vector<8x16xf32>
    %c33 = arith.constant 33 : index
    %178 = memref.load %arg2[%c33] : memref<72xf32, #tpu.memory_space<smem>>
    %179 = vector.extract_strided_slice %147 {offsets = [2, 0], sizes = [8, 16], strides = [1, 1]} : vector<10x18xf32> to vector<8x16xf32>
    %180 = vector.broadcast %178 : f32 to vector<8x16xf32>
    %181 = arith.mulf %180, %179 : vector<8x16xf32>
    %182 = arith.addf %177, %181 : vector<8x16xf32>
    %c34 = arith.constant 34 : index
    %183 = memref.load %arg2[%c34] : memref<72xf32, #tpu.memory_space<smem>>
    %184 = vector.extract_strided_slice %147 {offsets = [2, 1], sizes = [8, 16], strides = [1, 1]} : vector<10x18xf32> to vector<8x16xf32>
    %185 = vector.broadcast %183 : f32 to vector<8x16xf32>
    %186 = arith.mulf %185, %184 : vector<8x16xf32>
    %187 = arith.addf %182, %186 : vector<8x16xf32>
    %c35 = arith.constant 35 : index
    %188 = memref.load %arg2[%c35] : memref<72xf32, #tpu.memory_space<smem>>
    %189 = vector.extract_strided_slice %147 {offsets = [2, 2], sizes = [8, 16], strides = [1, 1]} : vector<10x18xf32> to vector<8x16xf32>
    %190 = vector.broadcast %188 : f32 to vector<8x16xf32>
    %191 = arith.mulf %190, %189 : vector<8x16xf32>
    %192 = arith.addf %187, %191 : vector<8x16xf32>
    %c0_20 = arith.constant 0 : index
    %c0_21 = arith.constant 0 : index
    %c4_22 = arith.constant 4 : index
    %c0_23 = arith.constant 0 : index
    %c0_24 = arith.constant 0 : index
    %193 = vector.load %arg4[%c0_20, %c0_21, %c4_22, %c0_23, %c0_24] : memref<1x1x8x10x18xbf16, #tpu.memory_space<vmem>>, vector<1x1x1x10x18xbf16>
    %194 = vector.shape_cast %193 : vector<1x1x1x10x18xbf16> to vector<10x18xbf16>
    %195 = arith.extf %194 : vector<10x18xbf16> to vector<10x18xf32>
    %c36 = arith.constant 36 : index
    %196 = memref.load %arg2[%c36] : memref<72xf32, #tpu.memory_space<smem>>
    %197 = vector.extract_strided_slice %195 {offsets = [0, 0], sizes = [8, 16], strides = [1, 1]} : vector<10x18xf32> to vector<8x16xf32>
    %198 = vector.broadcast %196 : f32 to vector<8x16xf32>
    %199 = arith.mulf %198, %197 : vector<8x16xf32>
    %200 = arith.addf %192, %199 : vector<8x16xf32>
    %c37 = arith.constant 37 : index
    %201 = memref.load %arg2[%c37] : memref<72xf32, #tpu.memory_space<smem>>
    %202 = vector.extract_strided_slice %195 {offsets = [0, 1], sizes = [8, 16], strides = [1, 1]} : vector<10x18xf32> to vector<8x16xf32>
    %203 = vector.broadcast %201 : f32 to vector<8x16xf32>
    %204 = arith.mulf %203, %202 : vector<8x16xf32>
    %205 = arith.addf %200, %204 : vector<8x16xf32>
    %c38 = arith.constant 38 : index
    %206 = memref.load %arg2[%c38] : memref<72xf32, #tpu.memory_space<smem>>
    %207 = vector.extract_strided_slice %195 {offsets = [0, 2], sizes = [8, 16], strides = [1, 1]} : vector<10x18xf32> to vector<8x16xf32>
    %208 = vector.broadcast %206 : f32 to vector<8x16xf32>
    %209 = arith.mulf %208, %207 : vector<8x16xf32>
    %210 = arith.addf %205, %209 : vector<8x16xf32>
    %c39 = arith.constant 39 : index
    %211 = memref.load %arg2[%c39] : memref<72xf32, #tpu.memory_space<smem>>
    %212 = vector.extract_strided_slice %195 {offsets = [1, 0], sizes = [8, 16], strides = [1, 1]} : vector<10x18xf32> to vector<8x16xf32>
    %213 = vector.broadcast %211 : f32 to vector<8x16xf32>
    %214 = arith.mulf %213, %212 : vector<8x16xf32>
    %215 = arith.addf %210, %214 : vector<8x16xf32>
    %c40 = arith.constant 40 : index
    %216 = memref.load %arg2[%c40] : memref<72xf32, #tpu.memory_space<smem>>
    %217 = vector.extract_strided_slice %195 {offsets = [1, 1], sizes = [8, 16], strides = [1, 1]} : vector<10x18xf32> to vector<8x16xf32>
    %218 = vector.broadcast %216 : f32 to vector<8x16xf32>
    %219 = arith.mulf %218, %217 : vector<8x16xf32>
    %220 = arith.addf %215, %219 : vector<8x16xf32>
    %c41 = arith.constant 41 : index
    %221 = memref.load %arg2[%c41] : memref<72xf32, #tpu.memory_space<smem>>
    %222 = vector.extract_strided_slice %195 {offsets = [1, 2], sizes = [8, 16], strides = [1, 1]} : vector<10x18xf32> to vector<8x16xf32>
    %223 = vector.broadcast %221 : f32 to vector<8x16xf32>
    %224 = arith.mulf %223, %222 : vector<8x16xf32>
    %225 = arith.addf %220, %224 : vector<8x16xf32>
    %c42 = arith.constant 42 : index
    %226 = memref.load %arg2[%c42] : memref<72xf32, #tpu.memory_space<smem>>
    %227 = vector.extract_strided_slice %195 {offsets = [2, 0], sizes = [8, 16], strides = [1, 1]} : vector<10x18xf32> to vector<8x16xf32>
    %228 = vector.broadcast %226 : f32 to vector<8x16xf32>
    %229 = arith.mulf %228, %227 : vector<8x16xf32>
    %230 = arith.addf %225, %229 : vector<8x16xf32>
    %c43 = arith.constant 43 : index
    %231 = memref.load %arg2[%c43] : memref<72xf32, #tpu.memory_space<smem>>
    %232 = vector.extract_strided_slice %195 {offsets = [2, 1], sizes = [8, 16], strides = [1, 1]} : vector<10x18xf32> to vector<8x16xf32>
    %233 = vector.broadcast %231 : f32 to vector<8x16xf32>
    %234 = arith.mulf %233, %232 : vector<8x16xf32>
    %235 = arith.addf %230, %234 : vector<8x16xf32>
    %c44 = arith.constant 44 : index
    %236 = memref.load %arg2[%c44] : memref<72xf32, #tpu.memory_space<smem>>
    %237 = vector.extract_strided_slice %195 {offsets = [2, 2], sizes = [8, 16], strides = [1, 1]} : vector<10x18xf32> to vector<8x16xf32>
    %238 = vector.broadcast %236 : f32 to vector<8x16xf32>
    %239 = arith.mulf %238, %237 : vector<8x16xf32>
    %240 = arith.addf %235, %239 : vector<8x16xf32>
    %c0_25 = arith.constant 0 : index
    %c0_26 = arith.constant 0 : index
    %c5_27 = arith.constant 5 : index
    %c0_28 = arith.constant 0 : index
    %c0_29 = arith.constant 0 : index
    %241 = vector.load %arg4[%c0_25, %c0_26, %c5_27, %c0_28, %c0_29] : memref<1x1x8x10x18xbf16, #tpu.memory_space<vmem>>, vector<1x1x1x10x18xbf16>
    %242 = vector.shape_cast %241 : vector<1x1x1x10x18xbf16> to vector<10x18xbf16>
    %243 = arith.extf %242 : vector<10x18xbf16> to vector<10x18xf32>
    %c45 = arith.constant 45 : index
    %244 = memref.load %arg2[%c45] : memref<72xf32, #tpu.memory_space<smem>>
    %245 = vector.extract_strided_slice %243 {offsets = [0, 0], sizes = [8, 16], strides = [1, 1]} : vector<10x18xf32> to vector<8x16xf32>
    %246 = vector.broadcast %244 : f32 to vector<8x16xf32>
    %247 = arith.mulf %246, %245 : vector<8x16xf32>
    %248 = arith.addf %240, %247 : vector<8x16xf32>
    %c46 = arith.constant 46 : index
    %249 = memref.load %arg2[%c46] : memref<72xf32, #tpu.memory_space<smem>>
    %250 = vector.extract_strided_slice %243 {offsets = [0, 1], sizes = [8, 16], strides = [1, 1]} : vector<10x18xf32> to vector<8x16xf32>
    %251 = vector.broadcast %249 : f32 to vector<8x16xf32>
    %252 = arith.mulf %251, %250 : vector<8x16xf32>
    %253 = arith.addf %248, %252 : vector<8x16xf32>
    %c47 = arith.constant 47 : index
    %254 = memref.load %arg2[%c47] : memref<72xf32, #tpu.memory_space<smem>>
    %255 = vector.extract_strided_slice %243 {offsets = [0, 2], sizes = [8, 16], strides = [1, 1]} : vector<10x18xf32> to vector<8x16xf32>
    %256 = vector.broadcast %254 : f32 to vector<8x16xf32>
    %257 = arith.mulf %256, %255 : vector<8x16xf32>
    %258 = arith.addf %253, %257 : vector<8x16xf32>
    %c48 = arith.constant 48 : index
    %259 = memref.load %arg2[%c48] : memref<72xf32, #tpu.memory_space<smem>>
    %260 = vector.extract_strided_slice %243 {offsets = [1, 0], sizes = [8, 16], strides = [1, 1]} : vector<10x18xf32> to vector<8x16xf32>
    %261 = vector.broadcast %259 : f32 to vector<8x16xf32>
    %262 = arith.mulf %261, %260 : vector<8x16xf32>
    %263 = arith.addf %258, %262 : vector<8x16xf32>
    %c49 = arith.constant 49 : index
    %264 = memref.load %arg2[%c49] : memref<72xf32, #tpu.memory_space<smem>>
    %265 = vector.extract_strided_slice %243 {offsets = [1, 1], sizes = [8, 16], strides = [1, 1]} : vector<10x18xf32> to vector<8x16xf32>
    %266 = vector.broadcast %264 : f32 to vector<8x16xf32>
    %267 = arith.mulf %266, %265 : vector<8x16xf32>
    %268 = arith.addf %263, %267 : vector<8x16xf32>
    %c50 = arith.constant 50 : index
    %269 = memref.load %arg2[%c50] : memref<72xf32, #tpu.memory_space<smem>>
    %270 = vector.extract_strided_slice %243 {offsets = [1, 2], sizes = [8, 16], strides = [1, 1]} : vector<10x18xf32> to vector<8x16xf32>
    %271 = vector.broadcast %269 : f32 to vector<8x16xf32>
    %272 = arith.mulf %271, %270 : vector<8x16xf32>
    %273 = arith.addf %268, %272 : vector<8x16xf32>
    %c51 = arith.constant 51 : index
    %274 = memref.load %arg2[%c51] : memref<72xf32, #tpu.memory_space<smem>>
    %275 = vector.extract_strided_slice %243 {offsets = [2, 0], sizes = [8, 16], strides = [1, 1]} : vector<10x18xf32> to vector<8x16xf32>
    %276 = vector.broadcast %274 : f32 to vector<8x16xf32>
    %277 = arith.mulf %276, %275 : vector<8x16xf32>
    %278 = arith.addf %273, %277 : vector<8x16xf32>
    %c52 = arith.constant 52 : index
    %279 = memref.load %arg2[%c52] : memref<72xf32, #tpu.memory_space<smem>>
    %280 = vector.extract_strided_slice %243 {offsets = [2, 1], sizes = [8, 16], strides = [1, 1]} : vector<10x18xf32> to vector<8x16xf32>
    %281 = vector.broadcast %279 : f32 to vector<8x16xf32>
    %282 = arith.mulf %281, %280 : vector<8x16xf32>
    %283 = arith.addf %278, %282 : vector<8x16xf32>
    %c53 = arith.constant 53 : index
    %284 = memref.load %arg2[%c53] : memref<72xf32, #tpu.memory_space<smem>>
    %285 = vector.extract_strided_slice %243 {offsets = [2, 2], sizes = [8, 16], strides = [1, 1]} : vector<10x18xf32> to vector<8x16xf32>
    %286 = vector.broadcast %284 : f32 to vector<8x16xf32>
    %287 = arith.mulf %286, %285 : vector<8x16xf32>
    %288 = arith.addf %283, %287 : vector<8x16xf32>
    %c0_30 = arith.constant 0 : index
    %c0_31 = arith.constant 0 : index
    %c6_32 = arith.constant 6 : index
    %c0_33 = arith.constant 0 : index
    %c0_34 = arith.constant 0 : index
    %289 = vector.load %arg4[%c0_30, %c0_31, %c6_32, %c0_33, %c0_34] : memref<1x1x8x10x18xbf16, #tpu.memory_space<vmem>>, vector<1x1x1x10x18xbf16>
    %290 = vector.shape_cast %289 : vector<1x1x1x10x18xbf16> to vector<10x18xbf16>
    %291 = arith.extf %290 : vector<10x18xbf16> to vector<10x18xf32>
    %c54 = arith.constant 54 : index
    %292 = memref.load %arg2[%c54] : memref<72xf32, #tpu.memory_space<smem>>
    %293 = vector.extract_strided_slice %291 {offsets = [0, 0], sizes = [8, 16], strides = [1, 1]} : vector<10x18xf32> to vector<8x16xf32>
    %294 = vector.broadcast %292 : f32 to vector<8x16xf32>
    %295 = arith.mulf %294, %293 : vector<8x16xf32>
    %296 = arith.addf %288, %295 : vector<8x16xf32>
    %c55 = arith.constant 55 : index
    %297 = memref.load %arg2[%c55] : memref<72xf32, #tpu.memory_space<smem>>
    %298 = vector.extract_strided_slice %291 {offsets = [0, 1], sizes = [8, 16], strides = [1, 1]} : vector<10x18xf32> to vector<8x16xf32>
    %299 = vector.broadcast %297 : f32 to vector<8x16xf32>
    %300 = arith.mulf %299, %298 : vector<8x16xf32>
    %301 = arith.addf %296, %300 : vector<8x16xf32>
    %c56 = arith.constant 56 : index
    %302 = memref.load %arg2[%c56] : memref<72xf32, #tpu.memory_space<smem>>
    %303 = vector.extract_strided_slice %291 {offsets = [0, 2], sizes = [8, 16], strides = [1, 1]} : vector<10x18xf32> to vector<8x16xf32>
    %304 = vector.broadcast %302 : f32 to vector<8x16xf32>
    %305 = arith.mulf %304, %303 : vector<8x16xf32>
    %306 = arith.addf %301, %305 : vector<8x16xf32>
    %c57 = arith.constant 57 : index
    %307 = memref.load %arg2[%c57] : memref<72xf32, #tpu.memory_space<smem>>
    %308 = vector.extract_strided_slice %291 {offsets = [1, 0], sizes = [8, 16], strides = [1, 1]} : vector<10x18xf32> to vector<8x16xf32>
    %309 = vector.broadcast %307 : f32 to vector<8x16xf32>
    %310 = arith.mulf %309, %308 : vector<8x16xf32>
    %311 = arith.addf %306, %310 : vector<8x16xf32>
    %c58 = arith.constant 58 : index
    %312 = memref.load %arg2[%c58] : memref<72xf32, #tpu.memory_space<smem>>
    %313 = vector.extract_strided_slice %291 {offsets = [1, 1], sizes = [8, 16], strides = [1, 1]} : vector<10x18xf32> to vector<8x16xf32>
    %314 = vector.broadcast %312 : f32 to vector<8x16xf32>
    %315 = arith.mulf %314, %313 : vector<8x16xf32>
    %316 = arith.addf %311, %315 : vector<8x16xf32>
    %c59 = arith.constant 59 : index
    %317 = memref.load %arg2[%c59] : memref<72xf32, #tpu.memory_space<smem>>
    %318 = vector.extract_strided_slice %291 {offsets = [1, 2], sizes = [8, 16], strides = [1, 1]} : vector<10x18xf32> to vector<8x16xf32>
    %319 = vector.broadcast %317 : f32 to vector<8x16xf32>
    %320 = arith.mulf %319, %318 : vector<8x16xf32>
    %321 = arith.addf %316, %320 : vector<8x16xf32>
    %c60 = arith.constant 60 : index
    %322 = memref.load %arg2[%c60] : memref<72xf32, #tpu.memory_space<smem>>
    %323 = vector.extract_strided_slice %291 {offsets = [2, 0], sizes = [8, 16], strides = [1, 1]} : vector<10x18xf32> to vector<8x16xf32>
    %324 = vector.broadcast %322 : f32 to vector<8x16xf32>
    %325 = arith.mulf %324, %323 : vector<8x16xf32>
    %326 = arith.addf %321, %325 : vector<8x16xf32>
    %c61 = arith.constant 61 : index
    %327 = memref.load %arg2[%c61] : memref<72xf32, #tpu.memory_space<smem>>
    %328 = vector.extract_strided_slice %291 {offsets = [2, 1], sizes = [8, 16], strides = [1, 1]} : vector<10x18xf32> to vector<8x16xf32>
    %329 = vector.broadcast %327 : f32 to vector<8x16xf32>
    %330 = arith.mulf %329, %328 : vector<8x16xf32>
    %331 = arith.addf %326, %330 : vector<8x16xf32>
    %c62 = arith.constant 62 : index
    %332 = memref.load %arg2[%c62] : memref<72xf32, #tpu.memory_space<smem>>
    %333 = vector.extract_strided_slice %291 {offsets = [2, 2], sizes = [8, 16], strides = [1, 1]} : vector<10x18xf32> to vector<8x16xf32>
    %334 = vector.broadcast %332 : f32 to vector<8x16xf32>
    %335 = arith.mulf %334, %333 : vector<8x16xf32>
    %336 = arith.addf %331, %335 : vector<8x16xf32>
    %c0_35 = arith.constant 0 : index
    %c0_36 = arith.constant 0 : index
    %c7_37 = arith.constant 7 : index
    %c0_38 = arith.constant 0 : index
    %c0_39 = arith.constant 0 : index
    %337 = vector.load %arg4[%c0_35, %c0_36, %c7_37, %c0_38, %c0_39] : memref<1x1x8x10x18xbf16, #tpu.memory_space<vmem>>, vector<1x1x1x10x18xbf16>
    %338 = vector.shape_cast %337 : vector<1x1x1x10x18xbf16> to vector<10x18xbf16>
    %339 = arith.extf %338 : vector<10x18xbf16> to vector<10x18xf32>
    %c63 = arith.constant 63 : index
    %340 = memref.load %arg2[%c63] : memref<72xf32, #tpu.memory_space<smem>>
    %341 = vector.extract_strided_slice %339 {offsets = [0, 0], sizes = [8, 16], strides = [1, 1]} : vector<10x18xf32> to vector<8x16xf32>
    %342 = vector.broadcast %340 : f32 to vector<8x16xf32>
    %343 = arith.mulf %342, %341 : vector<8x16xf32>
    %344 = arith.addf %336, %343 : vector<8x16xf32>
    %c64 = arith.constant 64 : index
    %345 = memref.load %arg2[%c64] : memref<72xf32, #tpu.memory_space<smem>>
    %346 = vector.extract_strided_slice %339 {offsets = [0, 1], sizes = [8, 16], strides = [1, 1]} : vector<10x18xf32> to vector<8x16xf32>
    %347 = vector.broadcast %345 : f32 to vector<8x16xf32>
    %348 = arith.mulf %347, %346 : vector<8x16xf32>
    %349 = arith.addf %344, %348 : vector<8x16xf32>
    %c65 = arith.constant 65 : index
    %350 = memref.load %arg2[%c65] : memref<72xf32, #tpu.memory_space<smem>>
    %351 = vector.extract_strided_slice %339 {offsets = [0, 2], sizes = [8, 16], strides = [1, 1]} : vector<10x18xf32> to vector<8x16xf32>
    %352 = vector.broadcast %350 : f32 to vector<8x16xf32>
    %353 = arith.mulf %352, %351 : vector<8x16xf32>
    %354 = arith.addf %349, %353 : vector<8x16xf32>
    %c66 = arith.constant 66 : index
    %355 = memref.load %arg2[%c66] : memref<72xf32, #tpu.memory_space<smem>>
    %356 = vector.extract_strided_slice %339 {offsets = [1, 0], sizes = [8, 16], strides = [1, 1]} : vector<10x18xf32> to vector<8x16xf32>
    %357 = vector.broadcast %355 : f32 to vector<8x16xf32>
    %358 = arith.mulf %357, %356 : vector<8x16xf32>
    %359 = arith.addf %354, %358 : vector<8x16xf32>
    %c67 = arith.constant 67 : index
    %360 = memref.load %arg2[%c67] : memref<72xf32, #tpu.memory_space<smem>>
    %361 = vector.extract_strided_slice %339 {offsets = [1, 1], sizes = [8, 16], strides = [1, 1]} : vector<10x18xf32> to vector<8x16xf32>
    %362 = vector.broadcast %360 : f32 to vector<8x16xf32>
    %363 = arith.mulf %362, %361 : vector<8x16xf32>
    %364 = arith.addf %359, %363 : vector<8x16xf32>
    %c68 = arith.constant 68 : index
    %365 = memref.load %arg2[%c68] : memref<72xf32, #tpu.memory_space<smem>>
    %366 = vector.extract_strided_slice %339 {offsets = [1, 2], sizes = [8, 16], strides = [1, 1]} : vector<10x18xf32> to vector<8x16xf32>
    %367 = vector.broadcast %365 : f32 to vector<8x16xf32>
    %368 = arith.mulf %367, %366 : vector<8x16xf32>
    %369 = arith.addf %364, %368 : vector<8x16xf32>
    %c69 = arith.constant 69 : index
    %370 = memref.load %arg2[%c69] : memref<72xf32, #tpu.memory_space<smem>>
    %371 = vector.extract_strided_slice %339 {offsets = [2, 0], sizes = [8, 16], strides = [1, 1]} : vector<10x18xf32> to vector<8x16xf32>
    %372 = vector.broadcast %370 : f32 to vector<8x16xf32>
    %373 = arith.mulf %372, %371 : vector<8x16xf32>
    %374 = arith.addf %369, %373 : vector<8x16xf32>
    %c70 = arith.constant 70 : index
    %375 = memref.load %arg2[%c70] : memref<72xf32, #tpu.memory_space<smem>>
    %376 = vector.extract_strided_slice %339 {offsets = [2, 1], sizes = [8, 16], strides = [1, 1]} : vector<10x18xf32> to vector<8x16xf32>
    %377 = vector.broadcast %375 : f32 to vector<8x16xf32>
    %378 = arith.mulf %377, %376 : vector<8x16xf32>
    %379 = arith.addf %374, %378 : vector<8x16xf32>
    %c71 = arith.constant 71 : index
    %380 = memref.load %arg2[%c71] : memref<72xf32, #tpu.memory_space<smem>>
    %381 = vector.extract_strided_slice %339 {offsets = [2, 2], sizes = [8, 16], strides = [1, 1]} : vector<10x18xf32> to vector<8x16xf32>
    %382 = vector.broadcast %380 : f32 to vector<8x16xf32>
    %383 = arith.mulf %382, %381 : vector<8x16xf32>
    %384 = arith.addf %379, %383 : vector<8x16xf32>
    %c0_40 = arith.constant 0 : index
    %385 = memref.load %arg3[%c0_40] : memref<8xf32, #tpu.memory_space<smem>>
    %386 = vector.broadcast %385 : f32 to vector<8x16xf32>
    %387 = arith.mulf %384, %386 : vector<8x16xf32>
    %c4_41 = arith.constant 4 : index
    %388 = memref.load %arg3[%c4_41] : memref<8xf32, #tpu.memory_space<smem>>
    %389 = vector.broadcast %388 : f32 to vector<8x16xf32>
    %390 = arith.addf %387, %389 : vector<8x16xf32>
    %391 = arith.negf %390 : vector<8x16xf32>
    %392 = math.exp %391 : vector<8x16xf32>
    %cst_42 = arith.constant 1.000000e+00 : f32
    %393 = vector.broadcast %cst_42 : f32 to vector<8x16xf32>
    %394 = arith.addf %393, %392 : vector<8x16xf32>
    %395 = arith.divf %393, %394 : vector<8x16xf32>
    %c0_43 = arith.constant 0 : index
    %c0_44 = arith.constant 0 : index
    %c0_45 = arith.constant 0 : index
    %c0_46 = arith.constant 0 : index
    %c0_47 = arith.constant 0 : index
    %396 = vector.load %arg5[%c0_43, %c0_44, %c0_45, %c0_46, %c0_47] : memref<1x1x4x8x16xf32, #tpu.memory_space<vmem>>, vector<1x1x1x8x16xf32>
    %397 = vector.shape_cast %396 : vector<1x1x1x8x16xf32> to vector<8x16xf32>
    %398 = vector.shape_cast %395 : vector<8x16xf32> to vector<1x1x1x8x16xf32>
    tpu.vector_store %arg5[%c0_43, %c0_44, %c0_45, %c0_46, %c0_47], %398 {strides = array<i32>} : memref<1x1x4x8x16xf32, #tpu.memory_space<vmem>>, vector<1x1x1x8x16xf32>,
    %c1_48 = arith.constant 1 : index
    %399 = memref.load %arg3[%c1_48] : memref<8xf32, #tpu.memory_space<smem>>
    %400 = vector.broadcast %399 : f32 to vector<8x16xf32>
    %401 = arith.mulf %384, %400 : vector<8x16xf32>
    %c5_49 = arith.constant 5 : index
    %402 = memref.load %arg3[%c5_49] : memref<8xf32, #tpu.memory_space<smem>>
    %403 = vector.broadcast %402 : f32 to vector<8x16xf32>
    %404 = arith.addf %401, %403 : vector<8x16xf32>
    %405 = arith.negf %404 : vector<8x16xf32>
    %406 = math.exp %405 : vector<8x16xf32>
    %cst_50 = arith.constant 1.000000e+00 : f32
    %407 = vector.broadcast %cst_50 : f32 to vector<8x16xf32>
    %408 = arith.addf %407, %406 : vector<8x16xf32>
    %409 = arith.divf %407, %408 : vector<8x16xf32>
    %c0_51 = arith.constant 0 : index
    %c0_52 = arith.constant 0 : index
    %c1_53 = arith.constant 1 : index
    %c0_54 = arith.constant 0 : index
    %c0_55 = arith.constant 0 : index
    %410 = vector.load %arg5[%c0_51, %c0_52, %c1_53, %c0_54, %c0_55] : memref<1x1x4x8x16xf32, #tpu.memory_space<vmem>>, vector<1x1x1x8x16xf32>
    %411 = vector.shape_cast %410 : vector<1x1x1x8x16xf32> to vector<8x16xf32>
    %412 = vector.shape_cast %409 : vector<8x16xf32> to vector<1x1x1x8x16xf32>
    tpu.vector_store %arg5[%c0_51, %c0_52, %c1_53, %c0_54, %c0_55], %412 {strides = array<i32>} : memref<1x1x4x8x16xf32, #tpu.memory_space<vmem>>, vector<1x1x1x8x16xf32>,
    %c2_56 = arith.constant 2 : index
    %413 = memref.load %arg3[%c2_56] : memref<8xf32, #tpu.memory_space<smem>>
    %414 = vector.broadcast %413 : f32 to vector<8x16xf32>
    %415 = arith.mulf %384, %414 : vector<8x16xf32>
    %c6_57 = arith.constant 6 : index
    %416 = memref.load %arg3[%c6_57] : memref<8xf32, #tpu.memory_space<smem>>
    %417 = vector.broadcast %416 : f32 to vector<8x16xf32>
    %418 = arith.addf %415, %417 : vector<8x16xf32>
    %419 = arith.negf %418 : vector<8x16xf32>
    %420 = math.exp %419 : vector<8x16xf32>
    %cst_58 = arith.constant 1.000000e+00 : f32
    %421 = vector.broadcast %cst_58 : f32 to vector<8x16xf32>
    %422 = arith.addf %421, %420 : vector<8x16xf32>
    %423 = arith.divf %421, %422 : vector<8x16xf32>
    %c0_59 = arith.constant 0 : index
    %c0_60 = arith.constant 0 : index
    %c2_61 = arith.constant 2 : index
    %c0_62 = arith.constant 0 : index
    %c0_63 = arith.constant 0 : index
    %424 = vector.load %arg5[%c0_59, %c0_60, %c2_61, %c0_62, %c0_63] : memref<1x1x4x8x16xf32, #tpu.memory_space<vmem>>, vector<1x1x1x8x16xf32>
    %425 = vector.shape_cast %424 : vector<1x1x1x8x16xf32> to vector<8x16xf32>
    %426 = vector.shape_cast %423 : vector<8x16xf32> to vector<1x1x1x8x16xf32>
    tpu.vector_store %arg5[%c0_59, %c0_60, %c2_61, %c0_62, %c0_63], %426 {strides = array<i32>} : memref<1x1x4x8x16xf32, #tpu.memory_space<vmem>>, vector<1x1x1x8x16xf32>,
    %c3_64 = arith.constant 3 : index
    %427 = memref.load %arg3[%c3_64] : memref<8xf32, #tpu.memory_space<smem>>
    %428 = vector.broadcast %427 : f32 to vector<8x16xf32>
    %429 = arith.mulf %384, %428 : vector<8x16xf32>
    %c7_65 = arith.constant 7 : index
    %430 = memref.load %arg3[%c7_65] : memref<8xf32, #tpu.memory_space<smem>>
    %431 = vector.broadcast %430 : f32 to vector<8x16xf32>
    %432 = arith.addf %429, %431 : vector<8x16xf32>
    %433 = arith.negf %432 : vector<8x16xf32>
    %434 = math.exp %433 : vector<8x16xf32>
    %cst_66 = arith.constant 1.000000e+00 : f32
    %435 = vector.broadcast %cst_66 : f32 to vector<8x16xf32>
    %436 = arith.addf %435, %434 : vector<8x16xf32>
    %437 = arith.divf %435, %436 : vector<8x16xf32>
    %c0_67 = arith.constant 0 : index
    %c0_68 = arith.constant 0 : index
    %c3_69 = arith.constant 3 : index
    %c0_70 = arith.constant 0 : index
    %c0_71 = arith.constant 0 : index
    %438 = vector.load %arg5[%c0_67, %c0_68, %c3_69, %c0_70, %c0_71] : memref<1x1x4x8x16xf32, #tpu.memory_space<vmem>>, vector<1x1x1x8x16xf32>
    %439 = vector.shape_cast %438 : vector<1x1x1x8x16xf32> to vector<8x16xf32>
    %440 = vector.shape_cast %437 : vector<8x16xf32> to vector<1x1x1x8x16xf32>
    tpu.vector_store %arg5[%c0_67, %c0_68, %c3_69, %c0_70, %c0_71], %440 {strides = array<i32>} : memref<1x1x4x8x16xf32, #tpu.memory_space<vmem>>, vector<1x1x1x8x16xf32>,
    return
  }
  func.func @transform_0(%arg0: i32, %arg1: i32) -> i32 {
    %c0_i32 = arith.constant 0 : i32
    %c0_i32_0 = arith.constant 0 : i32
    return %c0_i32 : i32
  }
  func.func @transform_1(%arg0: i32, %arg1: i32) -> i32 {
    %c0_i32 = arith.constant 0 : i32
    %c0_i32_0 = arith.constant 0 : i32
    return %c0_i32 : i32
  }
  func.func @transform_2(%arg0: i32, %arg1: i32) -> (i32, i32, i32, i32, i32) {
    %c0_i32 = arith.constant 0 : i32
    %c0_i32_0 = arith.constant 0 : i32
    %c0_i32_1 = arith.constant 0 : i32
    %c0_i32_2 = arith.constant 0 : i32
    return %arg0, %arg1, %c0_i32, %c0_i32_0, %c0_i32_1 : i32, i32, i32, i32, i32
  }
  func.func @transform_3(%arg0: i32, %arg1: i32) -> (i32, i32, i32, i32, i32) {
    %c0_i32 = arith.constant 0 : i32
    %c0_i32_0 = arith.constant 0 : i32
    %c0_i32_1 = arith.constant 0 : i32
    %c0_i32_2 = arith.constant 0 : i32
    return %arg0, %arg1, %c0_i32, %c0_i32_0, %c0_i32_1 : i32, i32, i32, i32, i32
  }
}

</mosaic_0001>

<bundles_post_ra>
// kernel: squeeze.3
= control target key start
LH: loop header
LB: loop body
LE: loop exit
PB: predicated region body
PF: predicated region fallthrough
CT: control target
= control target key end

     0   :  { %s227_s22 = smov 63   ;;  %s228_s23 = smov 66   ;;  %vm42_vm0 = vcmask 23552   ;;  %vm48_vm1 = vcmask 589352   ;;  %vm54_vm2 = vcmask 564752   ;;  %vm60_vm3 = vcmask 540152   ;;  %s286_s0 = inlined_call_operand.vmem [shape: f32[1,8,3,3], index: 0, kind: input, shape index: {}]   ;;  %s287_s1 = inlined_call_operand.vmem [shape: f32[72], index: 1, kind: output, shape index: {}]  }
   0x1   :  { %v196_v0 = vld [vmem:[%s286_s0 + $0x1c] sm:$0xf]  ;;  %v197_v1 = vld [vmem:[%s286_s0 + $0x18] sm:$0xf]  ;;  %v198_v2 = vld [vmem:[%s286_s0 + $0x14] sm:$0xf] }
   0x2   :  { %9 = vst [vmem:[#allocation1 + $0x38] sm:$0xf] %v196_v0  ;;  %14 = vst [vmem:[#allocation1 + $0x30] sm:$0xf] %v197_v1  ;;  %v199_v3 = vld [vmem:[%s286_s0 + $0x10] sm:$0xf] }
   0x3   :  { %19 = vst [vmem:[#allocation1 + $0x28] sm:$0xf] %v198_v2  ;;  %24 = vst [vmem:[#allocation1 + $0x20] sm:$0xf] %v199_v3  ;;  %v200_v4 = vld [vmem:[%s286_s0 + $0xc] sm:$0xf] }
   0x4   :  { %v201_v5 = vld [vmem:[%s286_s0 + $0x8] sm:$0xf]  ;;  %29 = vst [vmem:[#allocation1 + $0x18] sm:$0xf] %v200_v4  ;;  %v202_v6 = vld [vmem:[%s286_s0 + $0x4] sm:$0xf] }
   0x5   :  { %34 = vst [vmem:[#allocation1 + $0x10] sm:$0xf] %v201_v5  ;;  %v39_v7 = vld [vmem:[%s286_s0] sm:$0xf]  ;;  %38 = vst [vmem:[#allocation1 + $0x8] sm:$0xf] %v202_v6 }
   0x6   :  { %40 = vst [vmem:[#allocation1] sm:$0xf] %v39_v7  ;;  %s226_s0 = smov 69   ;;  %s229_s24 = smov 60   ;;  %vm66_vm4 = vcmask 515552   ;;  %vm72_vm5 = vcmask 490952  }
   0x7   :  { %s230_s25 = smov 57   ;;  %s231_s26 = smov 54   ;;  %vm78_vm6 = vcmask 466352   ;;  %vm84_vm7 = vcmask 441752   ;;  %vm90_vm8 = vcmask 417152   ;;  %vm96_vm9 = vcmask 392552  }
   0x8   :  { %s232_s27 = smov 51   ;;  %s233_s28 = smov 48   ;;  %vm102_vm10 = vcmask 367952   ;;  %vm108_vm11 = vcmask 343352   ;;  %vm114_vm12 = vcmask 318752   ;;  %vm120_vm13 = vcmask 294152  }
   0x9   :  { %v45_v8 = vld [vmem:[#allocation1 + $0x3a] sm:$0x1]   ;;  %v57_v9 = vld [vmem:[#allocation1 + $0x38] sm:$0x1]   ;;  %v51_v10 = vld [vmem:[#allocation1 + $0x39] sm:$0x1]  }
   0xa   :  { %46 = vrot.lane.b32.xlu0 %v45_v8, %s226_s0  ;;  %58 = vrot.lane.b32.xlu1 %v57_v9, %s227_s22  ;;  %v63_v11 = vld [vmem:[#allocation1 + $0x32] sm:$0x1]   ;;  %v69_v12 = vld [vmem:[#allocation1 + $0x31] sm:$0x1]   ;;  %v75_v13 = vld [vmem:[#allocation1 + $0x30] sm:$0x1]  }
   0xb   :  { %v81_v15 = vld [vmem:[#allocation1 + $0x2a] sm:$0x1]   ;;  %v87_v16 = vld [vmem:[#allocation1 + $0x29] sm:$0x1]   ;;  %v93_v17 = vld [vmem:[#allocation1 + $0x28] sm:$0x1]  }
   0xc   :  { %v99_v18 = vld [vmem:[#allocation1 + $0x22] sm:$0x1]   ;;  %s234_s29 = smov 45   ;;  %s235_s30 = smov 42   ;;  %v105_v19 = vld [vmem:[#allocation1 + $0x21] sm:$0x1]  }
   0xd   :  { %v41_v14 = vld [vmem:[#allocation1] sm:$0x1]   ;;  %s236_s2 = smov 39   ;;  %s237_s3 = smov 36   ;;  %v117_v21 = vld [vmem:[#allocation1 + $0x1a] sm:$0x1]  }
   0xe   :  { %52 = vrot.lane.b32.xlu0 %v51_v10, %s228_s23  ;;  %64 = vrot.lane.b32.xlu1 %v63_v11, %s229_s24  ;;  %43 = vst.msk [vmem:[#allocation0] sm:$0x1] %vm42_vm0, %v41_v14   ;;  %v111_v20 = vld [vmem:[#allocation1 + $0x20] sm:$0x1]   ;;  %v123_v22 = vld [vmem:[#allocation1 + $0x19] sm:$0x1]  }
   0xf   :  { %s238_s4 = smov 33   ;;  %s239_s5 = smov 30   ;;  %v129_v23 = vld [vmem:[#allocation1 + $0x18] sm:$0x1]   ;;  %v135_v24 = vld [vmem:[#allocation1 + $0x12] sm:$0x1]  }
  0x10   :  { %s240_s6 = smov 27   ;;  %s241_s7 = smov 24   ;;  %v141_v25 = vld [vmem:[#allocation1 + $0x11] sm:$0x1]   ;;  %v147_v26 = vld [vmem:[#allocation1 + $0x10] sm:$0x1]  }
  0x11   :  { %s242_s8 = smov 21   ;;  %s243_s9 = smov 18   ;;  %v153_v27 = vld [vmem:[#allocation1 + $0xa] sm:$0x1]   ;;  %v159_v28 = vld [vmem:[#allocation1 + $0x9] sm:$0x1]  }
  0x12   :  { %70 = vrot.lane.b32.xlu0 %v69_v12, %s230_s25  ;;  %76 = vrot.lane.b32.xlu1 %v75_v13, %s231_s26  ;;  %s244_s10 = smov 15   ;;  %s245_s11 = smov 12   ;;  %v165_v29 = vld [vmem:[#allocation1 + $0x8] sm:$0x1]   ;;  %v171_v30 = vld [vmem:[#allocation1 + $0x2] sm:$0x1]  }
  0x13   :  { %s246_s12 = smov 9   ;;  %s247_s13 = smov 6   ;;  %v177_v31 = vld [vmem:[#allocation1 + $0x1] sm:$0x1]   ;;  %vm126_vm14 = vcmask 269552   ;;  %vm132_vm15 = vcmask 244952  }
  0x14   :  { %s248_s14 = smov 3   ;;  %vm138_vm0 = vcmask 220352  }
  0x16   :  { %82 = vrot.lane.b32.xlu0 %v81_v15, %s232_s27  ;;  %88 = vrot.lane.b32.xlu1 %v87_v16, %s233_s28 }
  0x1a   :  { %94 = vrot.lane.b32.xlu0 %v93_v17, %s234_s29  ;;  %100 = vrot.lane.b32.xlu1 %v99_v18, %s235_s30 }
  0x1e   :  { %106 = vrot.lane.b32.xlu0 %v105_v19, %s236_s2  ;;  %112 = vrot.lane.b32.xlu1 %v111_v20, %s237_s3 }
  0x22   :  { %118 = vrot.lane.b32.xlu0 %v117_v21, %s238_s4  ;;  %124 = vrot.lane.b32.xlu1 %v123_v22, %s239_s5 }
  0x26   :  { %130 = vrot.lane.b32.xlu0 %v129_v23, %s240_s6  ;;  %136 = vrot.lane.b32.xlu1 %v135_v24, %s241_s7 }
  0x2a   :  { %142 = vrot.lane.b32.xlu0 %v141_v25, %s242_s8  ;;  %148 = vrot.lane.b32.xlu1 %v147_v26, %s243_s9 }
  0x2e   :  { %154 = vrot.lane.b32.xlu0 %v153_v27, %s244_s10  ;;  %160 = vrot.lane.b32.xlu1 %v159_v28, %s245_s11 }
  0x32   :  { %166 = vrot.lane.b32.xlu0 %v165_v29, %s246_s12  ;;  %172 = vrot.lane.b32.xlu1 %v171_v30, %s247_s13 }
  0x36   :  { %178 = vrot.lane.b32.xlu0 %v177_v31, %s248_s14 }
  0x7c   :  { %v47_v32 = vpop.permute.xlu0 %46   ;;  %v59_v33 = vpop.permute.xlu1 %58  }
  0x7d   :  { %49 = vst.msk [vmem:[#allocation0] sm:$0x1] %vm48_vm1, %v47_v32   ;;  %vm144_vm1 = vcmask 195752  }
  0x80   :  { %v53_v34 = vpop.permute.xlu0 %52   ;;  %v65_v35 = vpop.permute.xlu1 %64  }
  0x81   :  { %55 = vst.msk [vmem:[#allocation0] sm:$0x1] %vm54_vm2, %v53_v34   ;;  %vm150_vm2 = vcmask 171152  }
  0x82   :  { %61 = vst.msk [vmem:[#allocation0] sm:$0x1] %vm60_vm3, %v59_v33   ;;  %vm156_vm3 = vcmask 146552  }
  0x83   :  { %67 = vst.msk [vmem:[#allocation0] sm:$0x1] %vm66_vm4, %v65_v35   ;;  %vm162_vm4 = vcmask 121952  }
  0x84   :  { %v71_v36 = vpop.permute.xlu0 %70   ;;  %v77_v37 = vpop.permute.xlu1 %76  }
  0x85   :  { %73 = vst.msk [vmem:[#allocation0] sm:$0x1] %vm72_vm5, %v71_v36   ;;  %vm168_vm5 = vcmask 97352  }
  0x86   :  { %79 = vst.msk [vmem:[#allocation0] sm:$0x1] %vm78_vm6, %v77_v37   ;;  %vm174_vm6 = vcmask 72752  }
  0x88   :  { %v83_v38 = vpop.permute.xlu0 %82   ;;  %v89_v39 = vpop.permute.xlu1 %88  }
  0x89   :  { %85 = vst.msk [vmem:[#allocation0] sm:$0x1] %vm84_vm7, %v83_v38   ;;  %vm180_vm7 = vcmask 48152  }
  0x8a   :  { %91 = vst.msk [vmem:[#allocation0] sm:$0x1] %vm90_vm8, %v89_v39  }
  0x8c   :  { %v95_v40 = vpop.permute.xlu0 %94   ;;  %v101_v41 = vpop.permute.xlu1 %100  }
  0x8d   :  { %97 = vst.msk [vmem:[#allocation0] sm:$0x1] %vm96_vm9, %v95_v40  }
  0x8e   :  { %103 = vst.msk [vmem:[#allocation0] sm:$0x1] %vm102_vm10, %v101_v41  }
  0x90   :  { %v107_v42 = vpop.permute.xlu0 %106   ;;  %v113_v43 = vpop.permute.xlu1 %112  }
  0x91   :  { %109 = vst.msk [vmem:[#allocation0] sm:$0x1] %vm108_vm11, %v107_v42  }
  0x92   :  { %115 = vst.msk [vmem:[#allocation0] sm:$0x1] %vm114_vm12, %v113_v43  }
  0x94   :  { %v119_v44 = vpop.permute.xlu0 %118   ;;  %v125_v45 = vpop.permute.xlu1 %124  }
  0x95   :  { %121 = vst.msk [vmem:[#allocation0] sm:$0x1] %vm120_vm13, %v119_v44  }
  0x96   :  { %127 = vst.msk [vmem:[#allocation0] sm:$0x1] %vm126_vm14, %v125_v45  }
  0x98   :  { %v131_v46 = vpop.permute.xlu0 %130   ;;  %v137_v47 = vpop.permute.xlu1 %136  }
  0x99   :  { %133 = vst.msk [vmem:[#allocation0] sm:$0x1] %vm132_vm15, %v131_v46  }
  0x9a   :  { %139 = vst.msk [vmem:[#allocation0] sm:$0x1] %vm138_vm0, %v137_v47  }
  0x9c   :  { %v143_v48 = vpop.permute.xlu0 %142   ;;  %v149_v49 = vpop.permute.xlu1 %148  }
  0x9d   :  { %145 = vst.msk [vmem:[#allocation0] sm:$0x1] %vm144_vm1, %v143_v48  }
  0x9e   :  { %151 = vst.msk [vmem:[#allocation0] sm:$0x1] %vm150_vm2, %v149_v49  }
  0xa0   :  { %v155_v50 = vpop.permute.xlu0 %154   ;;  %v161_v51 = vpop.permute.xlu1 %160  }
  0xa1   :  { %157 = vst.msk [vmem:[#allocation0] sm:$0x1] %vm156_vm3, %v155_v50  }
  0xa2   :  { %163 = vst.msk [vmem:[#allocation0] sm:$0x1] %vm162_vm4, %v161_v51  }
  0xa4   :  { %v167_v52 = vpop.permute.xlu0 %166   ;;  %v173_v53 = vpop.permute.xlu1 %172  }
  0xa5   :  { %169 = vst.msk [vmem:[#allocation0] sm:$0x1] %vm168_vm5, %v167_v52  }
  0xa6   :  { %175 = vst.msk [vmem:[#allocation0] sm:$0x1] %vm174_vm6, %v173_v53  }
  0xa8   :  { %v179_v54 = vpop.permute.xlu0 %178  }
  0xa9   :  { %181 = vst.msk [vmem:[#allocation0] sm:$0x1] %vm180_vm7, %v179_v54  }
  0xb0   :  { %v186_v55 = vld [vmem:[#allocation0] sm:$0x1] }
  0xb1   :  { %189 = vst [vmem:[%s287_s1] sm:$0x1] %v186_v55 }

// kernel: newcrfs_deconv_disp_head.1
= control target key start
LH: loop header
LB: loop body
LE: loop exit
PB: predicated region body
PF: predicated region fallthrough
CT: control target
= control target key end

     0   :  { %8 = vsyncpa [#allocation3], 0  ;;  %s2117_s0 = inlined_call_operand.vmem [shape: f32[72], index: 0, kind: input, shape index: {}]   ;;  %s2118_s1 = inlined_call_operand.vmem [shape: f32[8], index: 1, kind: input, shape index: {}]   ;;  %s2119_s2 = inlined_call_operand.vmem [shape: bf16[2,2,8,10,18], index: 2, kind: input, shape index: {}]   ;;  %s2120_s3 = inlined_call_operand.vmem [shape: f32[2,2,4,8,16], index: 3, kind: output, shape index: {}]  }
   0x1   :  { %9 = vsyncpa [#allocation5], 0  ;;  %s1498_s12 = smov 0   ;;  %s1500_s13 = smov 0  }
   0x2   :  { %s1502_s14 = smov 0   ;;  %s1504_s15 = smov 0  }
   0x3   :  { %s1506_s16 = smov 0  }
   0x4 LB: > { %s1201_s17 = sadd.s32 4294967295, %s1472_s16   ;;  %s24_s18 = sadd.s32 1, %s1464_s14  ;;  %s1472_s16 = sphi %s1506_s16, %s15_s16   ;;  %s1468_s15 = sphi %s1504_s15, %s2132_s15   ;;  %s1464_s14 = sphi %s1502_s14, %s2131_s14   ;;  %s1460_s13 = sphi %s1500_s13, %s2130_s13   ;;  %s1456_s12 = sphi %s1498_s12, %s2129_s12  }
   0x5   : > { %p25_p0 = scmp.ge.s32.totalorder %s24_s18, 2  ;;  %s27_s19 = sadd.s32 1, %s1468_s15 }
   0x6   : > { %p1203_p1 = scmp.ge.s32.totalorder %s1472_s16, 1  ;;  %p130_p2 = scmp.lt.s32.totalorder %s1472_s16, 5 }
   0x7   : > { %s2134_s18 = smov (%p25_p0, %s24_s18), 0  ;;  %s2136_s19 = smov (!%p25_p0, %s27_s19), %s1468_s15 }
   0x8   : > { %p1531_p3 = pnand %p1203_p1, %p130_p2  ;;  %p29_p4 = scmp.ge.s32.totalorder %s2136_s19, 2 }
   0x9   : > { %p1535_p5 = scmp.eq.s32.totalorder %s1201_s17, 0  ;;  %s143_s24 = sshll.u32 %s2117_s0, 4  ;;  %s144_s24 = int_to_ptr.vmem [resolvable:$true] %s143_s24 }
   0xa   : > { %s2124_s20 = scalar_select %p1531_p3, 1, 0 }
   0xb   : > { %s2125_s21 = scalar_select %p1535_p5, 1, 0 }
   0xc   : > { %p1325_p6 = pneg %p1531_p3  ;;  %s2138_s19 = smov (%p29_p4, %s2136_s19), 0 }
   0xd   : > { %s154_s28 = sshll.u32 %s2118_s1, 4  ;;  %s1396_s29 = scalar_lea.vmem %s144_s24, 16  ;;  %s155_s28 = int_to_ptr.vmem [resolvable:$true] %s154_s28 }
   0xe   : > { %p1548_p7 = pnand %p1535_p5, %p1325_p6  ;;  %p1397_p8 = scmp.ne.s32.totalorder %s144_s24, %s1396_s29 }
   0xf   : > { %p1404_p12 = scmp.lt.s32.totalorder %s144_s24, %s144_s24  ;;  %p1405_p13 = scmp.lt.s32.totalorder %s1396_s29, %s1396_s29 }
  0x10   : > { %p1398_p9 = pneg %p1548_p7 }
  0x11   : > { %p1406_p0 = por %p1405_p13, %p1404_p12 }
  0x12   : > { %p1399_p10 = pnand %p1398_p9, %p1397_p8 }
  0x14   : > { %p1400_p11 = pneg %p1399_p10 }
  0x16   : > { %p1407_p1 = pnand %p1406_p0, %p1400_p11 }
  0x18   : > { %1410 = shalt.err (!%p1407_p1)
}
  0x19   : > { %s1474_s30 = smov [#allocation2]   ;;  %s1411_s4 = scalar_lea.vmem %s155_s28, 16 }
  0x1a   : > { %1328 = dma.vmem_to_smem (!%p1548_p7), %s144_s24, 16, %s1474_s30, [#allocation3]  }
  0x1b   : > { %p1412_p2 = scmp.ne.s32.totalorder %s155_s28, %s1411_s4  ;;  %p1419_p5 = scmp.lt.s32.totalorder %s155_s28, %s155_s28 }
  0x1c   : > { %p1420_p3 = scmp.lt.s32.totalorder %s1411_s4, %s1411_s4 }
  0x1d   : > { %p1414_p4 = pnand %p1412_p2, %p1398_p9 }
  0x1e   : > { %p1421_p8 = por %p1420_p3, %p1419_p5 }
  0x1f   : > { %p1415_p6 = pneg %p1414_p4 }
  0x21   : > { %p1422_p10 = pnand %p1421_p8, %p1415_p6 }
  0x23   : > { %1425 = shalt.err (!%p1422_p10)
}
  0x24   : > { %s1475_s5 = smov [#allocation4]   ;;  %p2127_p11 = scmp.ne.s32.totalorder %s2124_s20, 0 }
  0x25   : > { %1331 = dma.vmem_to_smem (!%p1548_p7), %s155_s28, 16, %s1475_s5, [#allocation5]  }
  0x26   : > { %179 = sbr.rel (%p2127_p11) target bundleno = 360 (0x168), region = 32  ;;  %p2128_p12 = scmp.ne.s32.totalorder (!%p2127_p11), %s2125_s21, 0 }
  0x2b   : > { %1447 = dma.done.wait (%p2128_p12), [#allocation3], 16  }
  0x2c   : > { %1449 = vsyncadd (%p2128_p12), [#allocation3], 4294967280 }
  0x2d   : > { %1451 = dma.done.wait (%p2128_p12), [#allocation5], 16  }
  0x2e   : > { %1453 = vsyncadd (%p2128_p12), [#allocation5], 4294967280 }
  0x2f   : > { %189 = sfence }
  0x30   : > { %p216_p3 = scmp.lt.s32.totalorder %s1460_s13, 1  ;;  %p218_p5 = scmp.lt.s32.totalorder %s1456_s12, 1  ;;  %vm264_vm0 = vcmask 1046528   ;;  %vm302_vm1 = vcmask 1045504   ;;  %vm1039_vm2 = vcmask 130048  }
  0x31   : > { %s1216_s6 = sld [smem:[#allocation2 + $0x1]]  ;;  %s1476_s30 = smov 127  }
  0x32   : > { %s2140_s13 = smov (!%p216_p3, %s1460_s13), 1  ;;  %s2142_s12 = smov (!%p218_p5, %s1456_s12), 1 }
  0x33   : > { %s1211_s7 = sshll.u32 %s2140_s13, 5  ;;  %s1580_s8 = sld [smem:[#allocation2 + $0x2]] }
  0x34   : > { %s1210_s9 = sshll.u32 %s2142_s12, 4  ;;  %s1219_s11 = sld [smem:[#allocation2 + $0x4]] }
  0x35   : > { %s222_s10 = sadd.s32 %s1211_s7, %s1210_s9  ;;  %s1220_s20 = sld [smem:[#allocation2 + $0x5]] }
  0x36   : > { %s1212_s17 = sshll.u32 %s222_s10, 2  ;;  %s1588_s24 = sld [smem:[#allocation2 + $0x7]] }
  0x37   : > { %s1586_s23 = scalar_lea.vmem %s2119_s2, %s1212_s17  ;;  %v243_v1 = vstv %s1216_s6  ;;  %s1592_s25 = sld [smem:[#allocation2 + $0x8]] }
  0x38   : > { %v234_v0 = vld [vmem:[%s1586_s23] ss:$8 sps:$4 sm:$0xff]   ;;  %v235_v2 = vld [vmem:[%s1586_s23 + $0x4] sm:$0x1]  ;;  %s1598_s26 = sld [smem:[#allocation2 + $0xa]]  ;;  %s1477_s6 = smov 126  }
  0x39   : > { %v1594_v3 = vunpack.c.l.bf16 %v234_v0  ;;  %v1596_v4 = vunpack.c.l.bf16 %v235_v2  ;;  %v251_v5 = vstv %s1580_s8  ;;  %s1601_s27 = sld [smem:[#allocation2 + $0xb]]  ;;  %v1608_v11 = vunpack.c.h.bf16 %v234_v0  ;;  %v1225_v12 = vld [vmem:[%s1586_s23 + $0xc] sm:$0x1]  ;;  %v1236_v46 = vld [vmem:[%s1586_s23 + $0x14] sm:$0x1] }
  0x3a   : > { %v271_v7 = vstv %s1219_s11  ;;  %s1604_s28 = sld [smem:[#allocation2 + $0xd]]  ;;  %v1625_v24 = vunpack.c.l.bf16 %v1225_v12  ;;  %v1235_v52 = vld [vmem:[%s1586_s23 + $0x10] ss:$8 sps:$4 sm:$0xff]   ;;  %v1663_v53 = vunpack.c.l.bf16 %v1236_v46  ;;  %v1257_v46 = vld [vmem:[%s1586_s23 + $0x20] ss:$8 sps:$4 sm:$0xff]  }
  0x3b   : > { %v244_v6 = vmul.f32 %v243_v1, %v1594_v3  ;;  %v272_v8 = vmul.f32 %v271_v7, %v1594_v3  ;;  %v273_v9 = vmul.f32 %v271_v7, %v1596_v4  ;;  %v284_v10 = vstv %s1220_s20  ;;  %s1611_s29 = sld [smem:[#allocation2 + $0xe]] }
  0x3c   : > { %v252_v13 = vmul.f32 %v251_v5, %v1594_v3  ;;  %v285_v14 = vmul.f32 %v284_v10, %v1594_v3  ;;  %v286_v15 = vmul.f32 %v284_v10, %v1596_v4  ;;  %v309_v16 = vstv %s1588_s24  ;;  %s1618_s4 = sld [smem:[#allocation2 + $0x10]] }
  0x3d   : > { %246 = vrot.lane.b32.xlu0 %v244_v6, %s1476_s30  ;;  %v276_v17 = vrot.slane %v272_v8, 1  ;;  %v277_v18 = vrot.slane %v273_v9, 1  ;;  %v310_v19 = vmul.f32 %v309_v16, %v1594_v3  ;;  %v311_v20 = vmul.f32 %v309_v16, %v1596_v4  ;;  %s1622_s5 = sld [smem:[#allocation2 + $0x11]] }
  0x3e   : > { %v289_v21 = vrot.slane %v285_v14, 1  ;;  %v290_v22 = vrot.slane %v286_v15, 1  ;;  %v322_v23 = vstv %s1592_s25  ;;  %v344_v30 = vstv %s1598_s26  ;;  %s1636_s7 = sld [smem:[#allocation2 + $0x16]] }
  0x3f   : > { %v278_v25 = vsel %vm264_vm0, %v276_v17, %v277_v18  ;;  %v314_v26 = vrot.slane %v310_v19, 2  ;;  %v315_v27 = vrot.slane %v311_v20, 2  ;;  %v323_v28 = vmul.f32 %v322_v23, %v1594_v3  ;;  %s1648_s8 = sld [smem:[#allocation2 + $0x13]]  ;;  %v1247_v17 = vld [vmem:[%s1586_s23 + $0x1c] sm:$0x1] }
  0x40   : > { %279 = vrot.lane.b32.xlu1 %v278_v25, %s1476_s30  ;;  %v324_v29 = vmul.f32 %v322_v23, %v1596_v4  ;;  %v291_v31 = vsel %vm264_vm0, %v289_v21, %v290_v22  ;;  %v371_v34 = vstv %s1604_s28  ;;  %v345_v39 = vmul.f32 %v344_v30, %v1608_v11  ;;  %s1655_s9 = sld [smem:[#allocation2 + $0x17]] }
  0x41   : > { %254 = vrot.lane.b32.xlu0 %v252_v13, %s1477_s6  ;;  %v316_v32 = vsel %vm302_vm1, %v314_v26, %v315_v27  ;;  %v327_v33 = vrot.slane %v323_v28, 2  ;;  %v372_v36 = vmul.f32 %v371_v34, %v1608_v11  ;;  %v373_v37 = vmul.f32 %v371_v34, %v1625_v24  ;;  %s1657_s10 = sld [smem:[#allocation2 + $0x19]] }
  0x42   : > { %v328_v35 = vrot.slane %v324_v29, 2  ;;  %v384_v38 = vstv %s1611_s29  ;;  %v352_v40 = vstv %s1601_s27  ;;  %v408_v41 = vstv %s1618_s4  ;;  %s1661_s11 = sld [smem:[#allocation2 + $0x14]] }
  0x43   : > { %v376_v42 = vrot.slane %v372_v36, 1  ;;  %v377_v43 = vrot.slane %v373_v37, 1  ;;  %v385_v44 = vmul.f32 %v384_v38, %v1608_v11  ;;  %v386_v45 = vmul.f32 %v384_v38, %v1625_v24  ;;  %s1671_s17 = sld [smem:[#allocation2 + $0x1a]] }
  0x44   : > { %292 = vrot.lane.b32.xlu1 %v291_v31, %s1477_s6  ;;  %v329_v47 = vsel %vm302_vm1, %v327_v33, %v328_v35  ;;  %v409_v48 = vmul.f32 %v408_v41, %v1608_v11  ;;  %v410_v49 = vmul.f32 %v408_v41, %v1625_v24  ;;  %v421_v50 = vstv %s1622_s5  ;;  %s1683_s20 = sld [smem:[#allocation2 + $0x1f]] }
  0x45   : > { %317 = vrot.lane.b32.xlu0 %v316_v32, %s1476_s30  ;;  %v353_v51 = vmul.f32 %v352_v40, %v1608_v11  ;;  %v378_v54 = vsel %vm264_vm0, %v376_v42, %v377_v43  ;;  %v389_v55 = vrot.slane %v385_v44, 1  ;;  %v390_v56 = vrot.slane %v386_v45, 1  ;;  %s1688_s21 = sld [smem:[#allocation2 + $0x1c]] }
  0x46   : > { %v422_v57 = vmul.f32 %v421_v50, %v1608_v11  ;;  %v413_v58 = vrot.slane %v409_v48, 2  ;;  %v414_v59 = vrot.slane %v410_v49, 2  ;;  %v423_v60 = vmul.f32 %v421_v50, %v1625_v24  ;;  %s1695_s22 = sld [smem:[#allocation2 + $0x20]] }
  0x47   : > { %v470_v61 = vstv %s1636_s7  ;;  %v1673_v62 = vunpack.c.l.bf16 %v1235_v52  ;;  %v391_v63 = vsel %vm264_vm0, %v389_v55, %v390_v56  ;;  %v443_v0 = vstv %s1648_s8  ;;  %s1701_s24 = sld [smem:[#allocation2 + $0x22]] }
  0x48   : > { %330 = vrot.lane.b32.xlu1 %v329_v47, %s1477_s6  ;;  %v472_v2 = vmul.f32 %v470_v61, %v1663_v53  ;;  %v415_v5 = vsel %vm302_vm1, %v413_v58, %v414_v59  ;;  %v426_v6 = vrot.slane %v422_v57, 2  ;;  %v427_v7 = vrot.slane %v423_v60, 2  ;;  %s1704_s25 = sld [smem:[#allocation2 + $0x1d]]  ;;  %v1258_v47 = vld [vmem:[%s1586_s23 + $0x24] sm:$0x1] }
  0x49   : > { %347 = vrot.lane.b32.xlu0 %v345_v39, %s1476_s30  ;;  %v471_v1 = vmul.f32 %v470_v61, %v1673_v62  ;;  %v483_v8 = vstv %s1655_s9  ;;  %v507_v9 = vstv %s1657_s10  ;;  %v444_v10 = vmul.f32 %v443_v0, %v1673_v62  ;;  %s1712_s26 = sld [smem:[#allocation2 + $0x23]] }
  0x4a   : > { %v451_v12 = vstv %s1661_s11  ;;  %v476_v14 = vrot.slane %v472_v2, 1  ;;  %v484_v15 = vmul.f32 %v483_v8, %v1673_v62  ;;  %v485_v16 = vmul.f32 %v483_v8, %v1663_v53  ;;  %s1716_s27 = sld [smem:[#allocation2 + $0x25]] }
  0x4b   : > { %v475_v13 = vrot.slane %v471_v1, 1  ;;  %v428_v18 = vsel %vm302_vm1, %v426_v6, %v427_v7  ;;  %v508_v19 = vmul.f32 %v507_v9, %v1673_v62  ;;  %v509_v20 = vmul.f32 %v507_v9, %v1663_v53  ;;  %s1720_s28 = sld [smem:[#allocation2 + $0x28]] }
  0x4c   : > { %355 = vrot.lane.b32.xlu1 %v353_v51, %s1477_s6  ;;  %v520_v21 = vstv %s1671_s17  ;;  %v452_v22 = vmul.f32 %v451_v12, %v1673_v62  ;;  %v1706_v23 = vunpack.c.l.bf16 %v1247_v17  ;;  %v488_v26 = vrot.slane %v484_v15, 1  ;;  %s1722_s29 = sld [smem:[#allocation2 + $0x29]] }
  0x4d   : > { %379 = vrot.lane.b32.xlu0 %v378_v54, %s1476_s30  ;;  %v477_v25 = vsel %vm264_vm0, %v475_v13, %v476_v14  ;;  %v489_v27 = vrot.slane %v485_v16, 1  ;;  %v521_v28 = vmul.f32 %v520_v21, %v1673_v62  ;;  %v512_v29 = vrot.slane %v508_v19, 2  ;;  %s1730_s4 = sld [smem:[#allocation2 + $0x2b]] }
  0x4e   : > { %v513_v30 = vrot.slane %v509_v20, 2  ;;  %v522_v31 = vmul.f32 %v520_v21, %v1663_v53  ;;  %v569_v32 = vstv %s1683_s20  ;;  %v1718_v33 = vunpack.c.h.bf16 %v1235_v52  ;;  %s1734_s5 = sld [smem:[#allocation2 + $0x2c]] }
  0x4f   : > { %v542_v34 = vstv %s1688_s21  ;;  %v571_v36 = vmul.f32 %v569_v32, %v1706_v23  ;;  %v582_v37 = vstv %s1695_s22  ;;  %v490_v38 = vsel %vm264_vm0, %v488_v26, %v489_v27  ;;  %s1737_s7 = sld [smem:[#allocation2 + $0x26]] }
  0x50   : > { %392 = vrot.lane.b32.xlu1 %v391_v63, %s1477_s6  ;;  %v570_v35 = vmul.f32 %v569_v32, %v1718_v33  ;;  %v514_v39 = vsel %vm302_vm1, %v512_v29, %v513_v30  ;;  %v525_v40 = vrot.slane %v521_v28, 2  ;;  %v526_v41 = vrot.slane %v522_v31, 2  ;;  %s1757_s8 = sld [smem:[#allocation2 + $0x2e]]  ;;  %v1269_v28 = vld [vmem:[%s1586_s23 + $0x2c] sm:$0x1] }
  0x51   : > { %416 = vrot.lane.b32.xlu0 %v415_v5, %s1476_s30  ;;  %v606_v42 = vstv %s1701_s24  ;;  %v543_v43 = vmul.f32 %v542_v34, %v1718_v33  ;;  %v550_v44 = vstv %s1704_s25  ;;  %v583_v45 = vmul.f32 %v582_v37, %v1718_v33  ;;  %s1763_s9 = sld [smem:[#allocation2 + $0x3]] }
  0x52   : > { %v574_v48 = vrot.slane %v570_v35, 1  ;;  %v575_v49 = vrot.slane %v571_v36, 1  ;;  %v584_v50 = vmul.f32 %v582_v37, %v1706_v23  ;;  %v619_v51 = vstv %s1712_s26  ;;  %s1769_s10 = sld [smem:[#allocation2 + $0x31]] }
  0x53   : > { %v527_v52 = vsel %vm302_vm1, %v525_v40, %v526_v41  ;;  %v607_v54 = vmul.f32 %v606_v42, %v1718_v33  ;;  %v608_v55 = vmul.f32 %v606_v42, %v1706_v23  ;;  %v551_v56 = vmul.f32 %v550_v44, %v1718_v33  ;;  %s1773_s11 = sld [smem:[#allocation2 + $0x32]] }
  0x54   : > { %429 = vrot.lane.b32.xlu1 %v428_v18, %s1477_s6  ;;  %v1752_v57 = vunpack.c.l.bf16 %v1257_v46  ;;  %v1754_v58 = vunpack.c.l.bf16 %v1258_v47  ;;  %v668_v59 = vstv %s1720_s28  ;;  %v620_v60 = vmul.f32 %v619_v51, %v1718_v33  ;;  %s1779_s17 = sld [smem:[#allocation2 + $0x34]] }
  0x55   : > { %446 = vrot.lane.b32.xlu0 %v444_v10, %s1476_s30  ;;  %v621_v61 = vmul.f32 %v619_v51, %v1706_v23  ;;  %v641_v63 = vstv %s1716_s27  ;;  %v681_v0 = vstv %s1722_s29  ;;  %v576_v1 = vsel %vm264_vm0, %v574_v48, %v575_v49  ;;  %s1782_s20 = sld [smem:[#allocation2 + $0x2f]] }
  0x56   : > { %v587_v2 = vrot.slane %v583_v45, 1  ;;  %v588_v5 = vrot.slane %v584_v50, 1  ;;  %v705_v6 = vstv %s1730_s4  ;;  %v611_v7 = vrot.slane %v607_v54, 2  ;;  %s1789_s21 = sld [smem:[#allocation2 + $0x35]] }
  0x57   : > { %v612_v8 = vrot.slane %v608_v55, 2  ;;  %v669_v9 = vmul.f32 %v668_v59, %v1752_v57  ;;  %v718_v10 = vstv %s1734_s5  ;;  %v649_v12 = vstv %s1737_s7  ;;  %s1795_s22 = sld [smem:[#allocation2 + $0x6]] }
  0x58   : > { %454 = vrot.lane.b32.xlu1 %v452_v22, %s1477_s6  ;;  %v670_v13 = vmul.f32 %v668_v59, %v1754_v58  ;;  %v682_v14 = vmul.f32 %v681_v0, %v1752_v57  ;;  %v683_v15 = vmul.f32 %v681_v0, %v1754_v58  ;;  %v624_v16 = vrot.slane %v620_v60, 2  ;;  %s1807_s24 = sld [smem:[#allocation2 + $0x37]] }
  0x59   : > { %478 = vrot.lane.b32.xlu0 %v477_v25, %s1476_s30  ;;  %v625_v17 = vrot.slane %v621_v61, 2  ;;  %v706_v18 = vmul.f32 %v705_v6, %v1752_v57  ;;  %v589_v19 = vsel %vm264_vm0, %v587_v2, %v588_v5  ;;  %v707_v20 = vmul.f32 %v705_v6, %v1754_v58  ;;  %s1811_s25 = sld [smem:[#allocation2 + $0x3a]]  ;;  %v1833_v61 = vld [vmem:[%s1586_s23 + $0x30] ss:$8 sps:$4 sm:$0xff]  }
  0x5a   : > { %v719_v21 = vmul.f32 %v718_v10, %v1752_v57  ;;  %v613_v22 = vsel %vm302_vm1, %v611_v7, %v612_v8  ;;  %v642_v25 = vmul.f32 %v641_v63, %v1752_v57  ;;  %v650_v26 = vmul.f32 %v649_v12, %v1752_v57  ;;  %s1818_s26 = sld [smem:[#allocation2 + $0xc]] }
  0x5b   : > { %v673_v27 = vrot.slane %v669_v9, 1  ;;  %v674_v29 = vrot.slane %v670_v13, 1  ;;  %v686_v30 = vrot.slane %v682_v14, 1  ;;  %v687_v31 = vrot.slane %v683_v15, 1  ;;  %s1824_s27 = sld [smem:[#allocation2 + $0x3b]] }
  0x5c   : > { %491 = vrot.lane.b32.xlu1 %v490_v38, %s1477_s6  ;;  %v720_v32 = vmul.f32 %v718_v10, %v1754_v58  ;;  %v626_v34 = vsel %vm302_vm1, %v624_v16, %v625_v17  ;;  %v710_v35 = vrot.slane %v706_v18, 2  ;;  %v1799_v36 = vunpack.c.h.bf16 %v1257_v46  ;;  %s1835_s28 = sld [smem:[#allocation2 + $0x38]]  ;;  %v1280_v14 = vld [vmem:[%s1586_s23 + $0x34] sm:$0x1] }
  0x5d   : > { %515 = vrot.lane.b32.xlu0 %v514_v39, %s1476_s30  ;;  %v259_v37 = vstv %s1763_s9  ;;  %v711_v38 = vrot.slane %v707_v20, 2  ;;  %v723_v39 = vrot.slane %v719_v21, 2  ;;  %v740_v40 = vstv %s1757_s8  ;;  %s1845_s29 = sld [smem:[#allocation2 + $0x3d]] }
  0x5e   : > { %v1805_v41 = vunpack.c.l.bf16 %v1269_v28  ;;  %v767_v42 = vstv %s1769_s10  ;;  %v260_v44 = vmul.f32 %v259_v37, %v1594_v3  ;;  %v261_v45 = vmul.f32 %v259_v37, %v1596_v4  ;;  %s1858_s4 = sld [smem:[#allocation2 + $0xf]] }
  0x5f   : > { %v675_v46 = vsel %vm264_vm0, %v673_v27, %v674_v29  ;;  %v688_v47 = vsel %vm264_vm0, %v686_v30, %v687_v31  ;;  %v724_v48 = vrot.slane %v720_v32, 2  ;;  %v804_v49 = vstv %s1779_s17  ;;  %s1863_s5 = sld [smem:[#allocation2 + $0x15]] }
  0x60   : > { %528 = vrot.lane.b32.xlu1 %v527_v52, %s1477_s6  ;;  %v1821_v50 = vmul.f32 %v740_v40, %v1799_v36  ;;  %v748_v51 = vstv %s1782_s20  ;;  %v265_v52 = vrot.slane %v260_v44, 1  ;;  %v266_v54 = vrot.slane %v261_v45, 1  ;;  %s1872_s7 = sld [smem:[#allocation2 + $0x18]] }
  0x61   : > { %545 = vrot.lane.b32.xlu0 %v543_v43, %s1476_s30  ;;  %v780_v43 = vstv %s1773_s11  ;;  %v768_v55 = vmul.f32 %v767_v42, %v1799_v36  ;;  %v817_v60 = vstv %s1789_s21  ;;  %v805_v0 = vmul.f32 %v804_v49, %v1799_v36  ;;  %s1880_s8 = sld [smem:[#allocation2 + $0x3e]] }
  0x62   : > { %v781_v59 = vmul.f32 %v780_v43, %v1799_v36  ;;  %v782_v63 = vmul.f32 %v780_v43, %v1805_v41  ;;  %v297_v2 = vstv %s1795_s22  ;;  %v712_v5 = vsel %vm302_vm1, %v710_v35, %v711_v38  ;;  %s1888_s9 = sld [smem:[#allocation2 + $0x1e]] }
  0x63   : > { %v725_v6 = vsel %vm302_vm1, %v723_v39, %v724_v48  ;;  %v298_v7 = vmul.f32 %v297_v2, %v1594_v3  ;;  %v299_v8 = vmul.f32 %v297_v2, %v1596_v4  ;;  %v1850_v9 = vmul.f32 %v748_v51, %v1799_v36  ;;  %s1897_s10 = sld [smem:[#allocation2 + $0x21]] }
  0x64   : > { %553 = vrot.lane.b32.xlu1 %v551_v56, %s1477_s6  ;;  %v769_v56 = vmul.f32 %v767_v42, %v1805_v41  ;;  %v806_v10 = vmul.f32 %v804_v49, %v1805_v41  ;;  %v818_v12 = vmul.f32 %v817_v60, %v1799_v36  ;;  %v1855_v13 = vunpack.c.l.bf16 %v1833_v61  ;;  %s1907_s11 = sld [smem:[#allocation2 + $0x27]] }
  0x65   : > { %577 = vrot.lane.b32.xlu0 %v576_v1, %s1476_s30  ;;  %v1840_v1 = vsel %vm264_vm0, %v265_v52, %v266_v54  ;;  %v772_v4 = vrot.slane %v768_v55, 1  ;;  %v819_v15 = vmul.f32 %v817_v60, %v1805_v41  ;;  %v303_v16 = vrot.slane %v298_v7, 2  ;;  %s1929_s17 = sld [smem:[#allocation2 + $0x2a]] }
  0x66   : > { %v304_v17 = vrot.slane %v299_v8, 2  ;;  %v773_v18 = vrot.slane %v769_v56, 1  ;;  %v786_v20 = vrot.slane %v782_v63, 1  ;;  %v809_v21 = vrot.slane %v805_v0, 2  ;;  %s1943_s20 = sld [smem:[#allocation2 + $0x43]] }
  0x67   : > { %v360_v27 = vstv %s1818_s26  ;;  %v810_v28 = vrot.slane %v806_v10, 2  ;;  %v822_v29 = vrot.slane %v818_v12, 2  ;;  %v879_v30 = vstv %s1824_s27  ;;  %s1951_s21 = sld [smem:[#allocation2 + $0x40]] }
  0x68   : > { %590 = vrot.lane.b32.xlu1 %v589_v19, %s1477_s6  ;;  %v785_v19 = vrot.slane %v781_v59, 1  ;;  %v361_v31 = vmul.f32 %v360_v27, %v1608_v11  ;;  %v823_v32 = vrot.slane %v819_v15, 2  ;;  %v847_v35 = vstv %s1835_s28  ;;  %s1958_s22 = sld [smem:[#allocation2 + $0x44]] }
  0x69   : > { %614 = vrot.lane.b32.xlu0 %v613_v22, %s1476_s30  ;;  %v1865_v22 = vunpack.c.l.bf16 %v1280_v14  ;;  %v362_v37 = vmul.f32 %v360_v27, %v1625_v24  ;;  %v774_v38 = vsel %vm264_vm0, %v772_v4, %v773_v18  ;;  %v1894_v44 = vmul.f32 %v879_v30, %v1855_v13  ;;  %s1273_s26 = sld [smem:[#allocation2 + $0x30]] }
  0x6a   : > { %v787_v39 = vsel %vm264_vm0, %v785_v19, %v786_v20  ;;  %v365_v42 = vrot.slane %v361_v31, 1  ;;  %v903_v45 = vstv %s1845_s29  ;;  %v1904_v49 = vmul.f32 %v847_v35, %v1855_v13  ;;  %s1276_s27 = sld [smem:[#allocation2 + $0x33]] }
  0x6b   : > { %v397_v51 = vstv %s1858_s4  ;;  %v824_v52 = vsel %vm302_vm1, %v822_v29, %v823_v32  ;;  %v1914_v54 = vmul.f32 %v879_v30, %v1865_v22  ;;  %v1921_v59 = vmul.f32 %v903_v45, %v1855_v13  ;;  %s1284_s28 = sld [smem:[#allocation2 + $0x39]] }
  0x6c   : > { %627 = vrot.lane.b32.xlu1 %v626_v34, %s1477_s6  ;;  %v839_v34 = vstv %s1807_s24  ;;  %v398_v60 = vmul.f32 %v397_v51, %v1608_v11  ;;  %v399_v63 = vmul.f32 %v397_v51, %v1625_v24  ;;  %v884_v0 = vrot.slane %v1894_v44, 1  ;;  %s1968_s24 = sld [smem:[#allocation2 + $0x41]] }
  0x6d   : > { %644 = vrot.lane.b32.xlu0 %v642_v25, %s1476_s30  ;;  %v866_v25 = vstv %s1811_s25  ;;  %v1901_v48 = vmul.f32 %v839_v34, %v1855_v13  ;;  %v459_v2 = vstv %s1863_s5  ;;  %v885_v24 = vrot.slane %v1914_v54, 1  ;;  %s1974_s25 = sld [smem:[#allocation2 + $0x46]] }
  0x6e   : > { %v1886_v40 = vmul.f32 %v866_v25, %v1855_v13  ;;  %v1891_v43 = vmul.f32 %v866_v25, %v1865_v22  ;;  %v402_v7 = vrot.slane %v398_v60, 2  ;;  %v403_v8 = vrot.slane %v399_v63, 2  ;;  %s1287_s29 = sld [smem:[#allocation2 + $0x3c]] }
  0x6f   : > { %v460_v10 = vmul.f32 %v459_v2, %v1673_v62  ;;  %v461_v12 = vmul.f32 %v459_v2, %v1663_v53  ;;  %v916_v15 = vstv %s1880_s8  ;;  %v908_v25 = vrot.slane %v1921_v59, 2  ;;  %s238_s4 = sld [smem:[#allocation2]] }
  0x70   : > { %652 = vrot.lane.b32.xlu1 %v650_v26, %s1477_s6  ;;  %v1869_v26 = vsel %vm302_vm1, %v303_v16, %v304_v17  ;;  %v871_v56 = vrot.slane %v1886_v40, 1  ;;  %v1946_v16 = vsel %vm302_vm1, %v402_v7, %v403_v8  ;;  %v917_v34 = vmul.f32 %v916_v15, %v1855_v13  ;;  %v1291_v40 = vld [vmem:[%s1586_s23 + $0x3c] sm:$0x1]  ;;  %s1991_s23 = sld [smem:[#allocation2 + $0x47]] }
  0x71   : > { %676 = vrot.lane.b32.xlu0 %v675_v46, %s1476_s30  ;;  %v366_v46 = vrot.slane %v362_v37, 1  ;;  %v464_v17 = vrot.slane %v460_v10, 1  ;;  %v465_v18 = vrot.slane %v461_v12, 1  ;;  %v965_v7 = vstv %s1943_s20  ;;  %s1248_s5 = sld [smem:[#allocation2 + $0x1b]] }
  0x72   : > { %s1270_s8 = sld [smem:[#allocation2 + $0x2d]] }
  0x73   : > { %v1917_v55 = vsel %vm264_vm0, %v365_v42, %v366_v46  ;;  %v1961_v29 = vsel %vm264_vm0, %v464_v17, %v465_v18  ;;  %v756_v17 = vstv %s1273_s26  ;;  %s2089_s20 = sld [smem:[#allocation4]] }
  0x74   : > { %689 = vrot.lane.b32.xlu1 %v688_v47, %s1477_s6  ;;  %v811_v47 = vsel %vm302_vm1, %v809_v21, %v810_v28  ;;  %v657_v28 = vstv %s1907_s11  ;;  %v757_v18 = vmul.f32 %v756_v17, %v1799_v36  ;;  %s1292_s11 = sld [smem:[#allocation2 + $0x3f]] }
  0x75   : > { %713 = vrot.lane.b32.xlu0 %v712_v5, %s1476_s30  ;;  %v496_v5 = vstv %s1872_s7  ;;  %s1259_s7 = sld [smem:[#allocation2 + $0x24]] }
  0x76   : > { %v497_v14 = vmul.f32 %v496_v5, %v1673_v62  ;;  %v498_v4 = vmul.f32 %v496_v5, %v1663_v53  ;;  %v595_v53 = vstv %s1897_s10  ;;  %v1988_v5 = vunpack.c.l.bf16 %v1291_v40  ;;  %s1295_s10 = sld [smem:[#allocation2 + $0x42]] }
  0x77   : > { %v596_v32 = vmul.f32 %v595_v53, %v1718_v33  ;;  %v597_v37 = vmul.f32 %v595_v53, %v1706_v23  ;;  %s1311_s26 = sld [smem:[#allocation4 + $0x3]] }
  0x78   : > { %726 = vrot.lane.b32.xlu1 %v725_v6, %s1477_s6  ;;  %v1932_v6 = vmul.f32 %v903_v45, %v1865_v22  ;;  %v501_v19 = vrot.slane %v497_v14, 2  ;;  %v502_v20 = vrot.slane %v498_v4, 2  ;;  %v694_v45 = vstv %s1929_s17  ;;  %s1298_s17 = sld [smem:[#allocation2 + $0x45]] }
  0x79   : > { %743 = vrot.lane.b32.xlu0 %v1821_v50, %s1476_s30  ;;  %v872_v50 = vrot.slane %v1891_v43, 1  ;;  %v600_v42 = vrot.slane %v596_v32, 2  ;;  %v659_v43 = vmul.f32 %v657_v28, %v1754_v58  ;;  %v695_v59 = vmul.f32 %v694_v45, %v1752_v57 }
  0x7a   : > { %v1964_v30 = vsel %vm302_vm1, %v501_v19, %v502_v20  ;;  %v909_v60 = vrot.slane %v1932_v6, 2  ;;  %v696_v2 = vmul.f32 %v694_v45, %v1754_v58  ;;  %v921_v6 = vrot.slane %v917_v34, 2 }
  0x7b   : > { %v663_v63 = vrot.slane %v659_v43, 1  ;;  %v938_v58 = vstv %s1951_s21  ;;  %v978_v14 = vstv %s1958_s22  ;;  %v886_v4 = vsel %vm264_vm0, %v884_v0, %v885_v24  ;;  %s1303_s21 = sld [smem:[#allocation4 + $0x1]] }
  0x7c   : > { %751 = vrot.lane.b32.xlu1 %v1850_v9, %s1477_s6  ;;  %v558_v9 = vstv %s1888_s9  ;;  %v758_v19 = vmul.f32 %v756_v17, %v1805_v41  ;;  %v980_v24 = vmul.f32 %v978_v14, %v1988_v5  ;;  %v1015_v32 = vstv %s1991_s23  ;;  %s1281_s9 = sld [smem:[#allocation2 + $0x36]] }
  0x7d   : > { %775 = vrot.lane.b32.xlu0 %v774_v38, %s1476_s30  ;;  %v559_v21 = vmul.f32 %v558_v9, %v1718_v33  ;;  %v560_v27 = vmul.f32 %v558_v9, %v1706_v23  ;;  %v658_v38 = vmul.f32 %v657_v28, %v1752_v57  ;;  %v873_v23 = vsel %vm264_vm0, %v871_v56, %v872_v50  ;;  %s2092_s22 = sld [smem:[#allocation4 + $0x4]] }
  0x7e   : > { %v700_v50 = vrot.slane %v696_v2, 2  ;;  %v1002_v9 = vstv %s1974_s25  ;;  %s1307_s25 = sld [smem:[#allocation4 + $0x2]] }
  0x7f   : > { %v563_v31 = vrot.slane %v559_v21, 1  ;;  %v564_v35 = vrot.slane %v560_v27, 1  ;;  %v662_v51 = vrot.slane %v658_v38, 1  ;;  %v946_v21 = vstv %s1968_s24  ;;  %s1304_s24 = sld [smem:[#allocation4 + $0x5]] }
  0x80   : > { %788 = vrot.lane.b32.xlu1 %v787_v39, %s1477_s6  ;;  %v918_v39 = vmul.f32 %v916_v15, %v1865_v22  ;;  %v910_v15 = vsel %vm302_vm1, %v908_v25, %v909_v60  ;;  %v761_v25 = vrot.slane %v757_v18, 1  ;;  %v762_v27 = vrot.slane %v758_v19, 1  ;;  %s1308_s23 = sld [smem:[#allocation4 + $0x6]] }
  0x81   : > { %812 = vrot.lane.b32.xlu0 %v811_v47, %s1476_s30  ;;  %v1979_v46 = vsel %vm264_vm0, %v563_v31, %v564_v35  ;;  %v601_v47 = vrot.slane %v597_v37, 2  ;;  %v2000_v56 = vsel %vm264_vm0, %v662_v51, %v663_v63  ;;  %v1004_v31 = vmul.f32 %v1002_v9, %v1988_v5 }
  0x82   : > { %v922_v10 = vrot.slane %v918_v39, 2  ;;  %v2032_v34 = vsel %vm264_vm0, %v761_v25, %v762_v27  ;;  %v793_v38 = vstv %s1276_s27  ;;  %v984_v39 = vrot.slane %v980_v24, 1  ;;  %s1312_s27 = sld [smem:[#allocation4 + $0x7]] }
  0x83   : > { %v1994_v8 = vsel %vm302_vm1, %v600_v42, %v601_v47  ;;  %v794_v42 = vmul.f32 %v793_v38, %v1799_v36  ;;  %v795_v43 = vmul.f32 %v793_v38, %v1805_v41  ;;  %v1008_v51 = vrot.slane %v1004_v31, 2 }
  0x84   : > { %825 = vrot.lane.b32.xlu1 %v824_v52, %s1477_s6  ;;  %v699_v52 = vrot.slane %v695_v59, 2  ;;  %v923_v20 = vsel %vm302_vm1, %v921_v6, %v922_v10  ;;  %v1017_v59 = vmul.f32 %v1015_v32, %v1988_v5  ;;  %v855_v6 = vstv %s1284_s28  ;;  %s1213_s28 = sshll.u32 %s2142_s12, 2 }
  0x85   : > { %842 = vrot.lane.b32.xlu0 %v1901_v48, %s1476_s30  ;;  %v1997_v48 = vunpack.c.h.bf16 %v1833_v61  ;;  %v799_v60 = vrot.slane %v795_v43, 2  ;;  %v856_v10 = vmul.f32 %v855_v6, %v1855_v13 }
  0x86   : > { %v2009_v61 = vsel %vm302_vm1, %v699_v52, %v700_v50  ;;  %v1021_v52 = vrot.slane %v1017_v59, 2 }
  0x87   : > { %v966_v12 = vmul.f32 %v965_v7, %v1997_v48  ;;  %v939_v54 = vmul.f32 %v938_v58, %v1997_v48  ;;  %v979_v44 = vmul.f32 %v978_v14, %v1997_v48  ;;  %v1003_v28 = vmul.f32 %v1002_v9, %v1997_v48 }
  0x88   : > { %850 = vrot.lane.b32.xlu1 %v1904_v49, %s1477_s6  ;;  %v967_v49 = vmul.f32 %v965_v7, %v1988_v5  ;;  %v947_v35 = vmul.f32 %v946_v21, %v1997_v48  ;;  %v1016_v40 = vmul.f32 %v1015_v32, %v1997_v48  ;;  %v857_v58 = vmul.f32 %v855_v6, %v1865_v22 }
  0x89   : > { %874 = vrot.lane.b32.xlu0 %v873_v23, %s1476_s30  ;;  %v970_v0 = vrot.slane %v966_v12, 1  ;;  %v983_v37 = vrot.slane %v979_v44, 1  ;;  %v1007_v47 = vrot.slane %v1003_v28, 2  ;;  %v798_v23 = vrot.slane %v794_v42, 2 }
  0x8a   : > { %v971_v53 = vrot.slane %v967_v49, 1  ;;  %v1020_v41 = vrot.slane %v1016_v40, 2  ;;  %v860_v12 = vrot.slane %v856_v10, 1  ;;  %v861_v14 = vrot.slane %v857_v58, 1 }
  0x8b   : > { %v2045_v63 = vsel %vm302_vm1, %v798_v23, %v799_v60  ;;  %v985_v2 = vsel %vm264_vm0, %v983_v37, %v984_v39  ;;  %v1009_v7 = vsel %vm302_vm1, %v1007_v47, %v1008_v51 }
  0x8c   : > { %887 = vrot.lane.b32.xlu1 %v886_v4, %s1477_s6  ;;  %v972_v45 = vsel %vm264_vm0, %v970_v0, %v971_v53  ;;  %v1022_v50 = vsel %vm302_vm1, %v1020_v41, %v1021_v52  ;;  %v2056_v4 = vsel %vm264_vm0, %v860_v12, %v861_v14 }
  0x8d   : > { %911 = vrot.lane.b32.xlu0 %v910_v15, %s1476_s30  ;;  %v892_v15 = vstv %s1287_s29  ;;  %s1214_s29 = sshll.u32 %s2140_s13, 3 }
  0x8e   : > { %v893_v49 = vmul.f32 %v892_v15, %v1855_v13  ;;  %v894_v17 = vmul.f32 %v892_v15, %v1865_v22 }
  0x90   : > { %924 = vrot.lane.b32.xlu1 %v923_v20, %s1477_s6  ;;  %v897_v9 = vrot.slane %v893_v49, 2  ;;  %v898_v18 = vrot.slane %v894_v17, 2  ;;  %v239_v20 = vstv %s238_s4  ;;  %s231_s4 = sadd.s32 %s1214_s29, %s1213_s28 }
  0x91   : > { %941 = vrot.lane.b32.xlu0 %v939_v54, %s1476_s30  ;;  %v240_v54 = vmul.f32 %v239_v20, %v1594_v3  ;;  %v538_v20 = vstv %s1248_s5 }
  0x92   : > { %v2061_v19 = vsel %vm302_vm1, %v897_v9, %v898_v18 }
  0x94   : > { %949 = vrot.lane.b32.xlu1 %v947_v35, %s1477_s6 }
  0x95   : > { %973 = vrot.lane.b32.xlu0 %v972_v45, %s1476_s30 }
  0x98   : > { %986 = vrot.lane.b32.xlu1 %v985_v2, %s1477_s6 }
  0x99   : > { %1010 = vrot.lane.b32.xlu0 %v1009_v7, %s1476_s30  ;;  %s1226_s30 = sld [smem:[#allocation2 + $0x9]] }
  0x9c   : > { %1023 = vrot.lane.b32.xlu1 %v1022_v50, %s1477_s6  ;;  %s1237_s6 = sld [smem:[#allocation2 + $0x12]] }
  0x9f   : > { %v340_v32 = vstv %s1226_s30  ;;  %s1215_s30 = sshll.u32 %s231_s4, 3 }
  0xa0   : > { %v341_v39 = vmul.f32 %v340_v32, %v1608_v11 }
  0xa2   : > { %v439_v7 = vstv %s1237_s6 }
  0xa3   : > { %v440_v11 = vmul.f32 %v439_v7, %v1673_v62  ;;  %v539_v62 = vmul.f32 %v538_v20, %v1718_v33 }
  0xaf   : > { %v247_v21 = vpop.permute.xlu0 %246 }
  0xb0   : > { %v249_v44 = vadd.f32 %v247_v21, %v240_v54 }
  0xb2   : > { %v280_v24 = vpop.permute.xlu1 %279 }
  0xb3   : > { %v255_v0 = vpop.permute.xlu0 %254 }
  0xb4   : > { %v257_v25 = vadd.f32 %v255_v0, %v249_v44 }
  0xb6   : > { %v269_v27 = vadd.f32 %v1840_v1, %v257_v25  ;;  %v293_v53 = vpop.permute.xlu1 %292 }
  0xb7   : > { %v318_v22 = vpop.permute.xlu0 %317 }
  0xb8   : > { %v282_v28 = vadd.f32 %v280_v24, %v269_v27 }
  0xba   : > { %v295_v31 = vadd.f32 %v293_v53, %v282_v28  ;;  %v331_v37 = vpop.permute.xlu1 %330 }
  0xbb   : > { %v348_v40 = vpop.permute.xlu0 %347 }
  0xbc   : > { %v307_v35 = vadd.f32 %v1869_v26, %v295_v31 }
  0xbe   : > { %v320_v38 = vadd.f32 %v318_v22, %v307_v35  ;;  %v356_v43 = vpop.permute.xlu1 %355 }
  0xbf   : > { %v380_v51 = vpop.permute.xlu0 %379 }
  0xc0   : > { %v333_v3 = vadd.f32 %v331_v37, %v320_v38  ;;  %v637_v37 = vstv %s1259_s7  ;;  %s233_s7 = scalar_lea.vmem %s2120_s3, %s1215_s30 }
  0xc1   : > { %v638_v33 = vmul.f32 %v637_v37, %v1752_v57  ;;  %v991_v37 = vstv %s1298_s17 }
  0xc2   : > { %v342_v42 = vadd.f32 %v341_v39, %v333_v3  ;;  %v393_v59 = vpop.permute.xlu1 %392 }
  0xc3   : > { %v417_v2 = vpop.permute.xlu0 %416 }
  0xc4   : > { %v350_v45 = vadd.f32 %v348_v40, %v342_v42 }
  0xc6   : > { %v358_v47 = vadd.f32 %v356_v43, %v350_v45  ;;  %v430_v41 = vpop.permute.xlu1 %429 }
  0xc7   : > { %v447_v6 = vpop.permute.xlu0 %446 }
  0xc8   : > { %v369_v1 = vadd.f32 %v1917_v55, %v358_v47 }
  0xca   : > { %v382_v23 = vadd.f32 %v380_v51, %v369_v1  ;;  %v455_v58 = vpop.permute.xlu1 %454 }
  0xcb   : > { %v479_v15 = vpop.permute.xlu0 %478 }
  0xcc   : > { %v395_v60 = vadd.f32 %v393_v59, %v382_v23 }
  0xce   : > { %v406_v26 = vadd.f32 %v1946_v16, %v395_v60  ;;  %v492_v49 = vpop.permute.xlu1 %491 }
  0xcf   : > { %v516_v18 = vpop.permute.xlu0 %515 }
  0xd0   : > { %v419_v52 = vadd.f32 %v417_v2, %v406_v26  ;;  %v736_v2 = vstv %s1270_s8 }
  0xd1   : > { %v737_v57 = vmul.f32 %v736_v2, %v1799_v36 }
  0xd2   : > { %v432_v50 = vadd.f32 %v430_v41, %v419_v52  ;;  %v529_v54 = vpop.permute.xlu1 %528 }
  0xd3   : > { %v546_v0 = vpop.permute.xlu0 %545 }
  0xd4   : > { %v441_v10 = vadd.f32 %v440_v11, %v432_v50 }
  0xd6   : > { %v449_v12 = vadd.f32 %v447_v6, %v441_v10  ;;  %v554_v25 = vpop.permute.xlu1 %553 }
  0xd7   : > { %v578_v28 = vpop.permute.xlu0 %577 }
  0xd8   : > { %v457_v14 = vadd.f32 %v455_v58, %v449_v12 }
  0xda   : > { %v468_v55 = vadd.f32 %v1961_v29, %v457_v14  ;;  %v591_v31 = vpop.permute.xlu1 %590 }
  0xdb   : > { %v615_v35 = vpop.permute.xlu0 %614 }
  0xdc   : > { %v481_v17 = vadd.f32 %v479_v15, %v468_v55 }
  0xde   : > { %v494_v9 = vadd.f32 %v492_v49, %v481_v17  ;;  %v628_v38 = vpop.permute.xlu1 %627  ;;  %v835_v49 = vstv %s1281_s9 }
  0xdf   : > { %v645_v40 = vpop.permute.xlu0 %644  ;;  %v836_v36 = vmul.f32 %v835_v49, %v1855_v13 }
  0xe0   : > { %v505_v16 = vadd.f32 %v1964_v30, %v494_v9 }
  0xe2   : > { %v518_v21 = vadd.f32 %v516_v18, %v505_v16  ;;  %v653_v43 = vpop.permute.xlu1 %652 }
  0xe3   : > { %v677_v51 = vpop.permute.xlu0 %676 }
  0xe4   : > { %v531_v44 = vadd.f32 %v529_v54, %v518_v21 }
  0xe6   : > { %v540_v24 = vadd.f32 %v539_v62, %v531_v44  ;;  %v690_v1 = vpop.permute.xlu1 %689 }
  0xe7   : > { %v714_v60 = vpop.permute.xlu0 %713 }
  0xe8   : > { %v548_v27 = vadd.f32 %v546_v0, %v540_v24 }
  0xea   : > { %v556_v53 = vadd.f32 %v554_v25, %v548_v27  ;;  %v727_v7 = vpop.permute.xlu1 %726 }
  0xeb   : > { %v744_v52 = vpop.permute.xlu0 %743 }
  0xec   : > { %v567_v29 = vadd.f32 %v1979_v46, %v556_v53  ;;  %v934_v53 = vstv %s1292_s11 }
  0xee   : > { %v580_v22 = vadd.f32 %v578_v28, %v567_v29  ;;  %v752_v50 = vpop.permute.xlu1 %751 }
  0xef   : > { %v776_v58 = vpop.permute.xlu0 %775 }
  0xf0   : > { %v593_v32 = vadd.f32 %v591_v31, %v580_v22 }
  0xf2   : > { %v604_v30 = vadd.f32 %v1994_v8, %v593_v32  ;;  %v789_v12 = vpop.permute.xlu1 %788  ;;  %v935_v32 = vmul.f32 %v934_v53, %v1997_v48 }
  0xf3   : > { %v813_v55 = vpop.permute.xlu0 %812 }
  0xf4   : > { %v617_v39 = vadd.f32 %v615_v35, %v604_v30 }
  0xf6   : > { %v630_v3 = vadd.f32 %v628_v38, %v617_v39  ;;  %v826_v17 = vpop.permute.xlu1 %825 }
  0xf7   : > { %v843_v20 = vpop.permute.xlu0 %842 }
  0xf8   : > { %v639_v42 = vadd.f32 %v638_v33, %v630_v3  ;;  %v992_v3 = vmul.f32 %v991_v37, %v1997_v48 }
  0xfa   : > { %v647_v45 = vadd.f32 %v645_v40, %v639_v42  ;;  %v851_v54 = vpop.permute.xlu1 %850  ;;  %v993_v40 = vmul.f32 %v991_v37, %v1988_v5 }
  0xfc   : > { %v655_v47 = vadd.f32 %v653_v43, %v647_v45 }
  0xfe   : > { %v666_v46 = vadd.f32 %v2000_v56, %v655_v47  ;;  %v888_v0 = vpop.permute.xlu1 %887  ;;  %v996_v47 = vrot.slane %v992_v3, 2 }
 0x100   : > { %v679_v59 = vadd.f32 %v677_v51, %v666_v46  ;;  %v997_v51 = vrot.slane %v993_v40, 2 }
 0x102   : > { %v692_v23 = vadd.f32 %v690_v1, %v679_v59  ;;  %v925_v28 = vpop.permute.xlu1 %924 }
 0x104   : > { %v703_v8 = vadd.f32 %v2009_v61, %v692_v23 }
 0x106   : > { %v716_v26 = vadd.f32 %v714_v60, %v703_v8  ;;  %v950_v33 = vpop.permute.xlu1 %949 }
 0x108   : > { %v729_v41 = vadd.f32 %v727_v7, %v716_v26  ;;  %v1028_v7 = vstv %s2089_s20  ;;  %v1042_v26 = vstv %s1303_s21 }
 0x10a   : > { %v738_v11 = vadd.f32 %v737_v57, %v729_v41  ;;  %v987_v1 = vpop.permute.xlu1 %986  ;;  %v1056_v57 = vstv %s1307_s25  ;;  %v1070_v41 = vstv %s1311_s26 }
 0x10c   : > { %v746_v6 = vadd.f32 %v744_v52, %v738_v11  ;;  %v1031_v11 = vstv %s2092_s22 }
 0x10e   : > { %v754_v10 = vadd.f32 %v752_v50, %v746_v6  ;;  %v1024_v2 = vpop.permute.xlu1 %1023  ;;  %v1045_v50 = vstv %s1304_s24  ;;  %v1059_v6 = vstv %s1308_s23 }
 0x110   : > { %v765_v56 = vadd.f32 %v2032_v34, %v754_v10  ;;  %v875_v34 = vpop.permute.xlu0 %874  ;;  %v1073_v10 = vstv %s1312_s27 }
 0x112   : > { %v778_v14 = vadd.f32 %v776_v58, %v765_v56 }
 0x114   : > { %v791_v15 = vadd.f32 %v789_v12, %v778_v14  ;;  %v912_v27 = vpop.permute.xlu0 %911 }
 0x116   : > { %v802_v61 = vadd.f32 %v2045_v63, %v791_v15  ;;  %v954_v63 = vstv %s1295_s10 }
 0x117   : > { %v955_v29 = vmul.f32 %v954_v63, %v1997_v48  ;;  %v956_v31 = vmul.f32 %v954_v63, %v1988_v5  ;;  %v998_v48 = vsel %vm302_vm1, %v996_v47, %v997_v51 }
 0x118   : > { %v815_v9 = vadd.f32 %v813_v55, %v802_v61 }
 0x119   : > { %v959_v30 = vrot.slane %v955_v29, 1  ;;  %v960_v38 = vrot.slane %v956_v31, 1 }
 0x11a   : > { %v828_v18 = vadd.f32 %v826_v17, %v815_v9 }
 0x11b   : > { %v961_v42 = vsel %vm264_vm0, %v959_v30, %v960_v38 }
 0x11c   : > { %v837_v16 = vadd.f32 %v836_v36, %v828_v18 }
 0x11e   : > { %v845_v21 = vadd.f32 %v843_v20, %v837_v16 }
 0x120   : > { %v853_v62 = vadd.f32 %v851_v54, %v845_v21 }
 0x122   : > { %v864_v44 = vadd.f32 %v2056_v4, %v853_v62  ;;  %v942_v4 = vpop.permute.xlu0 %941 }
 0x124   : > { %v877_v24 = vadd.f32 %v875_v34, %v864_v44 }
 0x126   : > { %v890_v25 = vadd.f32 %v888_v0, %v877_v24  ;;  %v974_v45 = vpop.permute.xlu0 %973 }
 0x128   : > { %v901_v13 = vadd.f32 %v2061_v19, %v890_v25 }
 0x12a   : > { %v914_v22 = vadd.f32 %v912_v27, %v901_v13  ;;  %v1011_v23 = vpop.permute.xlu0 %1010 }
 0x12c   : > { %v927_v35 = vadd.f32 %v925_v28, %v914_v22 }
 0x12e   : > { %v936_v39 = vadd.f32 %v935_v32, %v927_v35 }
 0x130   : > { %v944_v19 = vadd.f32 %v942_v4, %v936_v39 }
 0x132   : > { %v952_v43 = vadd.f32 %v950_v33, %v944_v19 }
 0x134   : > { %v963_v46 = vadd.f32 %v961_v42, %v952_v43 }
 0x136   : > { %v976_v5 = vadd.f32 %v974_v45, %v963_v46 }
 0x138   : > { %v989_v59 = vadd.f32 %v987_v1, %v976_v5 }
 0x13a   : > { %v1000_v60 = vadd.f32 %v998_v48, %v989_v59 }
 0x13c   : > { %v1013_v8 = vadd.f32 %v1011_v23, %v1000_v60 }
 0x13e   : > { %v1026_v52 = vadd.f32 %v1024_v2, %v1013_v8 }
 0x140   : > { %v1029_v58 = vmul.f32 %v1028_v7, %v1026_v52  ;;  %v1043_v56 = vmul.f32 %v1042_v26, %v1026_v52  ;;  %v1057_v12 = vmul.f32 %v1056_v57, %v1026_v52  ;;  %v1071_v14 = vmul.f32 %v1070_v41, %v1026_v52 }
 0x142   : > { %v1032_v15 = vadd.f32 %v1031_v11, %v1029_v58  ;;  %v1046_v55 = vadd.f32 %v1045_v50, %v1043_v56  ;;  %v1060_v49 = vadd.f32 %v1059_v6, %v1057_v12  ;;  %v1074_v61 = vadd.f32 %v1073_v10, %v1071_v14 }
 0x144   : > { %v1302_v17 = vmul.f32 -1.442695, %v1032_v15  ;;  %v1305_v9 = vmul.f32 -1.442695, %v1046_v55  ;;  %v1309_v36 = vmul.f32 -1.442695, %v1060_v49 }
 0x145   : > { %v1313_v18 = vmul.f32 -1.442695, %v1074_v61 }
 0x146   : > { %1380 = vpow2.f32 %v1302_v17 }
 0x147   : > { %1382 = vpow2.f32 %v1305_v9 }
 0x148   : > { %1384 = vpow2.f32 %v1309_v36 }
 0x149   : > { %1386 = vpow2.f32 %v1313_v18 }
 0x153   : > { %v1381_v20 = vpop.eup %1380 }
 0x154   : > { %v1383_v16 = vpop.eup %1382  ;;  %v1036_v54 = vadd.f32 1.0, %v1381_v20 }
 0x155   : > { %v1385_v21 = vpop.eup %1384  ;;  %v1050_v62 = vadd.f32 1.0, %v1383_v16 }
 0x156   : > { %v1387_v34 = vpop.eup %1386  ;;  %1388 = vrcp.f32 %v1036_v54  ;;  %v1064_v44 = vadd.f32 1.0, %v1385_v21 }
 0x157   : > { %1390 = vrcp.f32 %v1050_v62  ;;  %v1078_v0 = vadd.f32 1.0, %v1387_v34 }
 0x158   : > { %1392 = vrcp.f32 %v1064_v44 }
 0x159   : > { %1394 = vrcp.f32 %v1078_v0 }
 0x163   : > { %v1389_v24 = vpop.eup %1388 }
 0x164   : > { %v1391_v25 = vpop.eup %1390  ;;  %1040 = vst.msk [vmem:[%s233_s7] sm:$0xff] %vm1039_vm2, %v1389_v24 }
 0x165   : > { %v1393_v63 = vpop.eup %1392  ;;  %1306 = vst.msk [vmem:[%s233_s7 + $0x8] sm:$0xff] %vm1039_vm2, %v1391_v25 }
 0x166   : > { %v1395_v27 = vpop.eup %1394  ;;  %1310 = vst.msk [vmem:[%s233_s7 + $0x10] sm:$0xff] %vm1039_vm2, %v1393_v63 }
 0x167   : > { %1314 = vst.msk [vmem:[%s233_s7 + $0x18] sm:$0xff] %vm1039_vm2, %v1395_v27 }
 0x168 PF: > { %s15_s16 = sadd.s32 1, %s1472_s16   ;;  %s2129_s12 = smov %s1464_s14 }
 0x169   : > { %p12_p7 = scmp.ge.s32.totalorder %s15_s16, 6   ;;  %s2130_s13 = smov %s1468_s15 }
 0x16a   : > { %s2131_s14 = smov %s2134_s18  ;;  %s2132_s15 = smov %s2138_s19 }
 0x16b   :  { %14 = sbr.rel (!%p12_p7) target bundleno = 4 (0x4), region = 81 }
 0x170   :  { %1112 = vsyncpa [#allocation3], 1 }
 0x171   :  { %1114 = vsyncpa [#allocation3 + $0x1], 1 }
 0x172   :  { %1115 = vsyncpa [#allocation5], 1 }

</bundles_post_ra>
